<compile_context>
chip_gen: v7x
topology: tpu7x:2x2x1
jax: 0.10.0
libtpu: 0.0.40
codegen_flags: <defaults>
</compile_context>

<pallas_src>
import functools

import jax
import jax.numpy as jnp
from jax.experimental import pallas as pl
from jax.experimental.pallas import tpu as pltpu


def _round_up(x, m):
    return (x + m - 1) // m * m


# ----------------------------------------------------------------------------
# Fused hierarchical decoder kernel (one batch tile per grid step)
# ----------------------------------------------------------------------------
def _hier_decoder_kernel(shelf_emb_ref, item_emb_ref, shelf_mask_ref, avail_ref,
                         wq_s_ref, wkvl_s_ref, wo_s_ref,
                         wq_i_ref, wkvl_i_ref, wo_i_ref,
                         shelf_probs_ref, sku_probs_ref,
                         sel_shelf_ref, sel_sku_ref,
                         *, tanh_clip):
    bt, ns, d = shelf_emb_ref.shape
    ni = item_emb_ref.shape[1]
    ns_pad = shelf_probs_ref.shape[-1]
    ni_pad = sku_probs_ref.shape[-1]

    shelf_e = shelf_emb_ref[...]          # [Bt, Ns, D] compute dtype (bf16/f32)
    item_e = item_emb_ref[...]            # [Bt, Ni, D]
    shelf_mask = shelf_mask_ref[...]      # [Bt, Ns]  f32 (1 = feasible)
    avail = avail_ref[...]                # [Bt, Ns, Ni] f32

    cdt = shelf_e.dtype
    scale = 1.0 / jnp.sqrt(jnp.float32(d))
    neg = jnp.float32(-1e9)

    def attn_probs(e, feas, q, wkvl, wo, n, n_pad, probs_ref):
        """One AttentionDecoder call over a (Bt, n, D) slab of node embeddings."""
        # fused K/V/logit projection: one lane-dense [Bt*n, D] @ [D, 3D] MXU pass
        e_flat = e.reshape(bt * n, d)
        kvl = jnp.dot(e_flat, wkvl, preferred_element_type=jnp.float32)   # [Bt*n, 3D]
        k = kvl[:, 0 * d:1 * d].reshape(bt, n, d)
        v = kvl[:, 1 * d:2 * d].reshape(bt, n, d)
        kl = kvl[:, 2 * d:3 * d].reshape(bt, n, d)

        # glimpse attention: contraction on the last dim (no explicit transpose)
        s = jnp.einsum('bqd,bnd->bqn', q[:, None, :], k,
                       preferred_element_type=jnp.float32)[:, 0, :] * scale
        s = jnp.where(feas, s, neg)
        s_max = jnp.max(s, axis=-1, keepdims=True)
        s_exp = jnp.where(feas, jnp.exp(s - s_max), 0.0)
        s_den = jnp.maximum(jnp.sum(s_exp, axis=-1, keepdims=True), 1e-9)
        attn = s_exp * pl.reciprocal(s_den, approx=True)                   # [Bt, n]

        glimpse = jnp.einsum('bqn,bnd->bqd', attn[:, None, :], v,
                             preferred_element_type=jnp.float32)[:, 0, :]  # [Bt, D]
        glimpse = jnp.dot(glimpse.astype(cdt), wo,
                          preferred_element_type=jnp.float32)              # [Bt, D]

        # single-head pointer logits with tanh clipping, masked softmax
        logits = jnp.einsum('bqd,bnd->bqn', glimpse[:, None, :], kl,
                            preferred_element_type=jnp.float32)[:, 0, :] * scale
        logits = tanh_clip * jnp.tanh(logits)
        logits = jnp.where(feas, logits, neg)
        l_max = jnp.max(logits, axis=-1, keepdims=True)
        l_exp = jnp.where(feas, jnp.exp(logits - l_max), 0.0)
        l_den = jnp.maximum(jnp.sum(l_exp, axis=-1, keepdims=True), 1e-9)
        probs = l_exp * pl.reciprocal(l_den, approx=True)                  # [Bt, n]

        # lane-dense store: one unmasked vst of a 128-multiple slab
        if n_pad > n:
            probs_ref[...] = jnp.concatenate(
                [probs, jnp.zeros((bt, n_pad - n), jnp.float32)], axis=-1)
        else:
            probs_ref[...] = probs
        return probs

    # ---- shelf decoder -------------------------------------------------------
    # TODO(synk): exact decoder_context_features / dynamic node & edge feature
    # updates depend on ModelParams (not provided); context = graph mean emb.
    shelf_feas = shelf_mask > 0.0                                          # reused
    shelf_ctx = jnp.mean(shelf_e.astype(jnp.float32), axis=1)              # [Bt, D]
    q_s = jnp.dot(shelf_ctx.astype(cdt), wq_s_ref[...],
                  preferred_element_type=jnp.float32)                      # [Bt, D]
    shelf_probs = attn_probs(shelf_e, shelf_feas, q_s,
                             wkvl_s_ref[...], wo_s_ref[...],
                             ns, ns_pad, shelf_probs_ref)

    # ---- greedy generator.step('shelf') + state.update(shelf=...) in-kernel --
    shelf_iota = jax.lax.broadcasted_iota(jnp.int32, (bt, ns), 1)
    best_s = jnp.max(shelf_probs, axis=-1, keepdims=True)
    sel_shelf = jnp.min(jnp.where(shelf_probs >= best_s, shelf_iota, ns),
                        axis=-1, keepdims=True)                            # [Bt, 1]
    onehot = (shelf_iota == sel_shelf).astype(jnp.float32)                 # [Bt, Ns]

    # gather chosen shelf's item-feasibility row + embedding via one-hot
    # contraction (broadcast-multiply + sublane reduce; no dynamic gather)
    item_mask = jnp.sum(onehot[:, :, None] * avail, axis=1)                # [Bt, Ni]
    cur_shelf = jnp.sum(onehot[:, :, None] * shelf_e.astype(jnp.float32),
                        axis=1)                                            # [Bt, D]

    # ---- item decoder --------------------------------------------------------
    item_feas = item_mask > 0.0
    item_graph = jnp.mean(item_e.astype(jnp.float32), axis=1)              # [Bt, D]
    # item context = [item graph emb ; selected shelf emb]; split-matmul avoids
    # an in-kernel concat:  ctx @ Wq == graph @ Wq[:D] + cur @ Wq[D:]
    q_i = (jnp.dot(item_graph.astype(cdt), wq_i_ref[:d, :],
                   preferred_element_type=jnp.float32)
           + jnp.dot(cur_shelf.astype(cdt), wq_i_ref[d:, :],
                     preferred_element_type=jnp.float32))                  # [Bt, D]
    sku_probs = attn_probs(item_e, item_feas, q_i,
                           wkvl_i_ref[...], wo_i_ref[...],
                           ni, ni_pad, sku_probs_ref)

    # greedy generator.step('sku') — raw index; dummy hook applied in wrapper
    item_iota = jax.lax.broadcasted_iota(jnp.int32, (bt, ni), 1)
    best_i = jnp.max(sku_probs, axis=-1, keepdims=True)
    sel_sku = jnp.min(jnp.where(sku_probs >= best_i, item_iota, ni),
                      axis=-1, keepdims=True)                              # [Bt, 1]

    sel_shelf_ref[...] = sel_shelf
    sel_sku_ref[...] = sel_sku


# ----------------------------------------------------------------------------
# Wrapper: HierarchicalAttnDecoder.forward (greedy generator)
# ----------------------------------------------------------------------------
def hierarchical_attn_decoder_forward(params, shelf_emb, item_emb,
                                      shelf_mask, shelf_item_avail, *,
                                      tanh_clip=10.0,
                                      compute_dtype=jnp.bfloat16,
                                      batch_tile=None):
    """shelf_emb [B,Ns,D], item_emb [B,Ni,D] (index 0 = dummy item),
    shelf_mask [B,Ns] (state.get_node_mask()),
    shelf_item_avail [B,Ns,Ni] (state.get_item_mask_from_node() source table)."""
    B, Ns, D = shelf_emb.shape
    Ni = item_emb.shape[1]

    # fuse K/V/logit projection weights once into a lane-dense [D, 3D] slab
    def fuse(p):
        wq, wk, wv, wo, wl = p
        return (wq.astype(compute_dtype),
                jnp.concatenate([wk, wv, wl], axis=-1).astype(compute_dtype),
                wo.astype(compute_dtype))

    wq_s, wkvl_s, wo_s = fuse(params["shelf"])
    wq_i, wkvl_i, wo_i = fuse(params["item"])

    shelf_e = shelf_emb.astype(compute_dtype)     # bf16 MXU operands (f32 acc)
    item_e = item_emb.astype(compute_dtype)
    shelf_mask = shelf_mask.astype(jnp.float32)
    avail = shelf_item_avail.astype(jnp.float32)

    ns_pad = _round_up(Ns, 128)                   # lane-dense prob outputs
    ni_pad = _round_up(Ni, 128)

    # batch tile: several batch rows per grid step amortize the ~0.35us/step
    # pipeline overhead and feed the MXU Bt*N rows at a time.
    # NOTE: re-derive / halve the tile on v7x (64 MiB VMEM vs 128 MiB).
    if batch_tile is None:
        batch_tile = B
        for cand in (64, 32, 16, 8):
            if B % cand == 0:
                batch_tile = cand
                break
    bt = batch_tile
    assert B % bt == 0, "batch_tile must divide the batch size"

    kernel = functools.partial(_hier_decoder_kernel, tanh_clip=tanh_clip)

    def wspec(shape):
        return pl.BlockSpec(shape, lambda b, _n=len(shape): (0,) * _n)

    outs = pl.pallas_call(
        kernel,
        out_shape=(
            jax.ShapeDtypeStruct((B, ns_pad), jnp.float32),   # shelf probs (padded)
            jax.ShapeDtypeStruct((B, ni_pad), jnp.float32),   # sku probs (padded)
            jax.ShapeDtypeStruct((B, 1), jnp.int32),          # selected shelf
            jax.ShapeDtypeStruct((B, 1), jnp.int32),          # selected sku (raw)
        ),
        grid=(B // bt,),
        in_specs=[
            pl.BlockSpec((bt, Ns, D), lambda b: (b, 0, 0)),   # shelf embeddings
            pl.BlockSpec((bt, Ni, D), lambda b: (b, 0, 0)),   # item embeddings
            pl.BlockSpec((bt, Ns), lambda b: (b, 0)),         # shelf mask
            pl.BlockSpec((bt, Ns, Ni), lambda b: (b, 0, 0)),  # shelf->item avail
            wspec(wq_s.shape), wspec(wkvl_s.shape), wspec(wo_s.shape),
            wspec(wq_i.shape), wspec(wkvl_i.shape), wspec(wo_i.shape),
        ],
        out_specs=(
            pl.BlockSpec((bt, ns_pad), lambda b: (b, 0)),
            pl.BlockSpec((bt, ni_pad), lambda b: (b, 0)),
            pl.BlockSpec((bt, 1), lambda b: (b, 0)),
            pl.BlockSpec((bt, 1), lambda b: (b, 0)),
        ),
        compiler_params=pltpu.CompilerParams(
            dimension_semantics=("parallel",)),   # shard batch across v7x cores
    )(shelf_e, item_e, shelf_mask, avail,
      wq_s, wkvl_s, wo_s, wq_i, wkvl_i, wo_i)

    shelf_probs_pad, sku_probs_pad, sel_shelf, sel_sku_raw = outs
    selected_shelf = sel_shelf[:, 0]
    # post_generator_hook == subtract_dummy_from_item_hook (key == 'sku')
    selected_sku = sel_sku_raw[:, 0] - 1

    return {
        "shelf_probs": shelf_probs_pad[:, :Ns],
        "sku_probs": sku_probs_pad[:, :Ni],
        "selected_shelf": selected_shelf,
        "selected_sku": selected_sku,
    }


# ----------------------------------------------------------------------------
# Pure-JAX reference (same math, exact reciprocal) for validation
# ----------------------------------------------------------------------------
def _reference_forward(params, shelf_emb, item_emb, shelf_mask, shelf_item_avail,
                       *, tanh_clip=10.0):
    def attn(e, ctx, mask, wq, wk, wv, wo, wl):
        d = e.shape[-1]
        scale = 1.0 / jnp.sqrt(jnp.float32(d))
        q = ctx @ wq
        k = jnp.einsum('bnd,de->bne', e, wk)
        v = jnp.einsum('bnd,de->bne', e, wv)
        kl = jnp.einsum('bnd,de->bne', e, wl)
        s = jnp.where(mask > 0, jnp.einsum('bd,bnd->bn', q, k) * scale, -1e9)
        a = jnp.where(mask > 0, jax.nn.softmax(s, axis=-1), 0.0)
        g = jnp.einsum('bn,bnd->bd', a, v) @ wo
        logits = tanh_clip * jnp.tanh(jnp.einsum('bd,bnd->bn', g, kl) * scale)
        logits = jnp.where(mask > 0, logits, -1e9)
        return jnp.where(mask > 0, jax.nn.softmax(logits, axis=-1), 0.0)

    shelf_probs = attn(shelf_emb, jnp.mean(shelf_emb, axis=1), shelf_mask,
                       *params["shelf"])
    sel_shelf = jnp.argmax(shelf_probs, axis=-1)
    item_mask = jnp.take_along_axis(
        shelf_item_avail, sel_shelf[:, None, None], axis=1)[:, 0, :]
    cur = jnp.take_along_axis(
        shelf_emb, sel_shelf[:, None, None], axis=1)[:, 0, :]
    item_ctx = jnp.concatenate([jnp.mean(item_emb, axis=1), cur], axis=-1)
    sku_probs = attn(item_emb, item_ctx, item_mask, *params["item"])
    sel_sku = jnp.argmax(sku_probs, axis=-1) - 1
    return shelf_probs, sku_probs, sel_shelf, sel_sku


# ----------------------------------------------------------------------------
# Deterministic parameter init (shapes implied by the attention decoders)
# ----------------------------------------------------------------------------
def init_params(key, d):
    # TODO(synk): prefer hidden sizes that are multiples of 128 (or pad weights
    # once at init) for full lane utilization; D=32 kept to match the demo.
    def lin(k, din, dout):
        return (jax.random.normal(k, (din, dout), jnp.float32)
                * (1.0 / jnp.sqrt(jnp.float32(din))))

    ks = jax.random.split(key, 10)
    shelf = (lin(ks[0], d, d), lin(ks[1], d, d), lin(ks[2], d, d),
             lin(ks[3], d, d), lin(ks[4], d, d))            # Wq Wk Wv Wo Wlogit
    item = (lin(ks[5], 2 * d, d), lin(ks[6], d, d), lin(ks[7], d, d),
            lin(ks[8], d, d), lin(ks[9], d, d))
    return {"shelf": shelf, "item": item}


if __name__ == "__main__":
    key = jax.random.PRNGKey(0)
    B, Ns, Ni, D = 2, 8, 8, 32
    k1, k2, k3, kp = jax.random.split(key, 4)

    shelf_emb = jax.random.normal(k1, (B, Ns, D), jnp.float32)
    item_emb = jax.random.normal(k2, (B, Ni, D), jnp.float32)
    shelf_mask = jnp.ones((B, Ns), jnp.float32)                  # all shelves feasible
    shelf_item_avail = (jax.random.uniform(k3, (B, Ns, Ni)) > 0.5).astype(jnp.float32)
    shelf_item_avail = shelf_item_avail.at[:, :, 0].set(1.0)     # dummy item feasible

    params = init_params(kp, D)

    # 1) f32 run: validate semantics against the pure-JAX reference
    out32 = hierarchical_attn_decoder_forward(
        params, shelf_emb, item_emb, shelf_mask, shelf_item_avail,
        compute_dtype=jnp.float32)
    jax.block_until_ready(out32)
    ref_sp, ref_ip, _, _ = _reference_forward(
        params, shelf_emb, item_emb, shelf_mask, shelf_item_avail)
    assert jnp.allclose(out32["shelf_probs"], ref_sp, atol=1e-2)
    assert jnp.allclose(out32["sku_probs"], ref_ip, atol=1e-2)
    assert jnp.array_equal(out32["selected_shelf"],
                           jnp.argmax(out32["shelf_probs"], axis=-1))
    assert jnp.array_equal(out32["selected_sku"],
                           jnp.argmax(out32["sku_probs"], axis=-1) - 1)

    # 2) default fast path (bf16 MXU operands, f32 softmax)
    out = hierarchical_attn_decoder_forward(
        params, shelf_emb, item_emb, shelf_mask, shelf_item_avail)
    jax.block_until_ready(out)
    assert jnp.allclose(jnp.sum(out["shelf_probs"], axis=-1), 1.0, atol=1e-2)
    assert jnp.allclose(jnp.sum(out["sku_probs"], axis=-1), 1.0, atol=1e-2)
    assert jnp.array_equal(out["selected_shelf"],
                           jnp.argmax(out["shelf_probs"], axis=-1))

    print("KERNEL_OK")
</pallas_src>

<mosaic_0001>
module attributes {stable_mosaic.version = 11 : i64} {
  func.func @_hier_decoder_kernel(%arg0: i32, %arg1: memref<2x8x32xf32, #tpu.memory_space<vmem>>, %arg2: memref<2x8x32xf32, #tpu.memory_space<vmem>>, %arg3: memref<2x8xf32, #tpu.memory_space<vmem>>, %arg4: memref<2x8x8xf32, #tpu.memory_space<vmem>>, %arg5: memref<32x32xf32, #tpu.memory_space<vmem>>, %arg6: memref<32x96xf32, #tpu.memory_space<vmem>>, %arg7: memref<32x32xf32, #tpu.memory_space<vmem>>, %arg8: memref<64x32xf32, #tpu.memory_space<vmem>>, %arg9: memref<32x96xf32, #tpu.memory_space<vmem>>, %arg10: memref<32x32xf32, #tpu.memory_space<vmem>>, %arg11: memref<2x128xf32, #tpu.memory_space<vmem>>, %arg12: memref<2x128xf32, #tpu.memory_space<vmem>>, %arg13: memref<2x1xi32, #tpu.memory_space<vmem>>, %arg14: memref<2x1xi32, #tpu.memory_space<vmem>>) attributes {dimension_semantics = [#tpu.dimension_semantics<parallel>], iteration_bounds = array<i64: 1>, scalar_prefetch = 0 : i64, scratch_operands = 0 : i64, tpu.core_type = #tpu.core_type<tc>, window_params = [{transform_indices = @transform_0, window_bounds = array<i64: 2, 8, 32>}, {transform_indices = @transform_1, window_bounds = array<i64: 2, 8, 32>}, {transform_indices = @transform_2, window_bounds = array<i64: 2, 8>}, {transform_indices = @transform_3, window_bounds = array<i64: 2, 8, 8>}, {pipeline_mode = #tpu.pipeline_mode<synchronous>, transform_indices = @transform_4, window_bounds = array<i64: 32, 32>}, {pipeline_mode = #tpu.pipeline_mode<synchronous>, transform_indices = @transform_5, window_bounds = array<i64: 32, 96>}, {pipeline_mode = #tpu.pipeline_mode<synchronous>, transform_indices = @transform_6, window_bounds = array<i64: 32, 32>}, {pipeline_mode = #tpu.pipeline_mode<synchronous>, transform_indices = @transform_7, window_bounds = array<i64: 64, 32>}, {pipeline_mode = #tpu.pipeline_mode<synchronous>, transform_indices = @transform_8, window_bounds = array<i64: 32, 96>}, {pipeline_mode = #tpu.pipeline_mode<synchronous>, transform_indices = @transform_9, window_bounds = array<i64: 32, 32>}, {transform_indices = @transform_10, window_bounds = array<i64: 2, 128>}, {transform_indices = @transform_11, window_bounds = array<i64: 2, 128>}, {transform_indices = @transform_12, window_bounds = array<i64: 2, 1>}, {transform_indices = @transform_13, window_bounds = array<i64: 2, 1>}]} {
    %c0 = arith.constant 0 : index
    %c0_0 = arith.constant 0 : index
    %c0_1 = arith.constant 0 : index
    %0 = vector.load %arg1[%c0, %c0_0, %c0_1] : memref<2x8x32xf32, #tpu.memory_space<vmem>>, vector<2x8x32xf32>
    %c0_2 = arith.constant 0 : index
    %c0_3 = arith.constant 0 : index
    %c0_4 = arith.constant 0 : index
    %1 = vector.load %arg2[%c0_2, %c0_3, %c0_4] : memref<2x8x32xf32, #tpu.memory_space<vmem>>, vector<2x8x32xf32>
    %c0_5 = arith.constant 0 : index
    %c0_6 = arith.constant 0 : index
    %2 = vector.load %arg3[%c0_5, %c0_6] : memref<2x8xf32, #tpu.memory_space<vmem>>, vector<2x8xf32>
    %c0_7 = arith.constant 0 : index
    %c0_8 = arith.constant 0 : index
    %c0_9 = arith.constant 0 : index
    %3 = vector.load %arg4[%c0_7, %c0_8, %c0_9] : memref<2x8x8xf32, #tpu.memory_space<vmem>>, vector<2x8x8xf32>
    %cst = arith.constant 3.200000e+01 : f32
    %4 = math.sqrt %cst : f32
    %cst_10 = arith.constant 1.000000e+00 : f32
    %5 = arith.divf %cst_10, %4 : f32
    %cst_11 = arith.constant 0.000000e+00 : f32
    %6 = vector.broadcast %cst_11 : f32 to vector<2x8xf32>
    %7 = arith.cmpf ogt, %2, %6 : vector<2x8xf32>
    %cst_12 = arith.constant dense<0.000000e+00> : vector<2x32xf32>
    %8 = vector.multi_reduction <add>, %0, %cst_12 [1] : vector<2x8x32xf32> to vector<2x32xf32>
    %cst_13 = arith.constant 8.000000e+00 : f32
    %9 = vector.broadcast %cst_13 : f32 to vector<2x32xf32>
    %10 = arith.divf %8, %9 : vector<2x32xf32>
    %c0_14 = arith.constant 0 : index
    %c0_15 = arith.constant 0 : index
    %11 = vector.load %arg5[%c0_14, %c0_15] : memref<32x32xf32, #tpu.memory_space<vmem>>, vector<32x32xf32>
    %cst_16 = arith.constant dense<0.000000e+00> : vector<2x32xf32>
    %12 = tpu.matmul %10, %11, %cst_16 {dimension_numbers = #tpu.dot_dimension_numbers<[1], [0], [0], [1], [0, 0, 1, 1], [], []>} : vector<2x32xf32>, vector<32x32xf32>, vector<2x32xf32> -> vector<2x32xf32>
    %c0_17 = arith.constant 0 : index
    %c0_18 = arith.constant 0 : index
    %13 = vector.load %arg6[%c0_17, %c0_18] : memref<32x96xf32, #tpu.memory_space<vmem>>, vector<32x96xf32>
    %c0_19 = arith.constant 0 : index
    %c0_20 = arith.constant 0 : index
    %14 = vector.load %arg7[%c0_19, %c0_20] : memref<32x32xf32, #tpu.memory_space<vmem>>, vector<32x32xf32>
    %15 = vector.shape_cast %0 : vector<2x8x32xf32> to vector<16x32xf32>
    %cst_21 = arith.constant dense<0.000000e+00> : vector<16x96xf32>
    %16 = tpu.matmul %15, %13, %cst_21 {dimension_numbers = #tpu.dot_dimension_numbers<[1], [0], [0], [1], [0, 0, 1, 1], [], []>} : vector<16x32xf32>, vector<32x96xf32>, vector<16x96xf32> -> vector<16x96xf32>
    %17 = vector.extract_strided_slice %16 {offsets = [0, 0], sizes = [16, 32], strides = [1, 1]} : vector<16x96xf32> to vector<16x32xf32>
    %18 = vector.shape_cast %17 : vector<16x32xf32> to vector<2x8x32xf32>
    %19 = vector.extract_strided_slice %16 {offsets = [0, 32], sizes = [16, 32], strides = [1, 1]} : vector<16x96xf32> to vector<16x32xf32>
    %20 = vector.shape_cast %19 : vector<16x32xf32> to vector<2x8x32xf32>
    %21 = vector.extract_strided_slice %16 {offsets = [0, 64], sizes = [16, 32], strides = [1, 1]} : vector<16x96xf32> to vector<16x32xf32>
    %22 = vector.shape_cast %21 : vector<16x32xf32> to vector<2x8x32xf32>
    %23 = vector.shape_cast %12 : vector<2x32xf32> to vector<2x1x32xf32>
    "tpu.trace_start"() <{level = 10 : i32, message = "bqd,bnd->bqn"}> : () -> ()
    %cst_22 = arith.constant dense<0.000000e+00> : vector<2x1x8xf32>
    %24 = tpu.matmul %23, %18, %cst_22 {dimension_numbers = #tpu.dot_dimension_numbers<[2], [2], [1], [1], [0, 0, 0, 1, 1, 1], [0], [0]>} : vector<2x1x32xf32>, vector<2x8x32xf32>, vector<2x1x8xf32> -> vector<2x1x8xf32>
    "tpu.trace_stop"() : () -> ()
    %25 = vector.shape_cast %24 : vector<2x1x8xf32> to vector<2x8xf32>
    %26 = vector.broadcast %5 : f32 to vector<2x8xf32>
    %27 = arith.mulf %25, %26 : vector<2x8xf32>
    %cst_23 = arith.constant -1.000000e+09 : f32
    %28 = vector.broadcast %cst_23 : f32 to vector<2x8xf32>
    %29 = arith.select %7, %27, %28 : vector<2x8xi1>, vector<2x8xf32>
    %cst_24 = arith.constant dense<0xFF800000> : vector<2xf32>
    %30 = vector.multi_reduction <maximumf>, %29, %cst_24 [1] : vector<2x8xf32> to vector<2xf32>
    %31 = vector.shape_cast %30 : vector<2xf32> to vector<2x1xf32>
    %32 = vector.broadcast %31 : vector<2x1xf32> to vector<2x8xf32>
    %33 = arith.subf %29, %32 : vector<2x8xf32>
    %34 = math.exp %33 : vector<2x8xf32>
    %cst_25 = arith.constant 0.000000e+00 : f32
    %35 = vector.broadcast %cst_25 : f32 to vector<2x8xf32>
    %36 = arith.select %7, %34, %35 : vector<2x8xi1>, vector<2x8xf32>
    %cst_26 = arith.constant dense<0.000000e+00> : vector<2xf32>
    %37 = vector.multi_reduction <add>, %36, %cst_26 [1] : vector<2x8xf32> to vector<2xf32>
    %38 = vector.shape_cast %37 : vector<2xf32> to vector<2x1xf32>
    %cst_27 = arith.constant 9.99999971E-10 : f32
    %39 = vector.broadcast %cst_27 : f32 to vector<2x1xf32>
    %40 = arith.maximumf %38, %39 : vector<2x1xf32>
    %41 = tpu.reciprocal %40 {approx = true} : vector<2x1xf32> -> vector<2x1xf32>
    %42 = vector.broadcast %41 : vector<2x1xf32> to vector<2x8xf32>
    %43 = arith.mulf %36, %42 : vector<2x8xf32>
    %44 = vector.shape_cast %43 : vector<2x8xf32> to vector<2x1x8xf32>
    "tpu.trace_start"() <{level = 10 : i32, message = "bqn,bnd->bqd"}> : () -> ()
    %cst_28 = arith.constant dense<0.000000e+00> : vector<2x1x32xf32>
    %45 = tpu.matmul %44, %20, %cst_28 {dimension_numbers = #tpu.dot_dimension_numbers<[2], [1], [1], [2], [0, 0, 0, 1, 1, 2], [0], [0]>} : vector<2x1x8xf32>, vector<2x8x32xf32>, vector<2x1x32xf32> -> vector<2x1x32xf32>
    "tpu.trace_stop"() : () -> ()
    %46 = vector.shape_cast %45 : vector<2x1x32xf32> to vector<2x32xf32>
    %cst_29 = arith.constant dense<0.000000e+00> : vector<2x32xf32>
    %47 = tpu.matmul %46, %14, %cst_29 {dimension_numbers = #tpu.dot_dimension_numbers<[1], [0], [0], [1], [0, 0, 1, 1], [], []>} : vector<2x32xf32>, vector<32x32xf32>, vector<2x32xf32> -> vector<2x32xf32>
    %48 = vector.shape_cast %47 : vector<2x32xf32> to vector<2x1x32xf32>
    "tpu.trace_start"() <{level = 10 : i32, message = "bqd,bnd->bqn"}> : () -> ()
    %cst_30 = arith.constant dense<0.000000e+00> : vector<2x1x8xf32>
    %49 = tpu.matmul %48, %22, %cst_30 {dimension_numbers = #tpu.dot_dimension_numbers<[2], [2], [1], [1], [0, 0, 0, 1, 1, 1], [0], [0]>} : vector<2x1x32xf32>, vector<2x8x32xf32>, vector<2x1x8xf32> -> vector<2x1x8xf32>
    "tpu.trace_stop"() : () -> ()
    %50 = vector.shape_cast %49 : vector<2x1x8xf32> to vector<2x8xf32>
    %51 = vector.broadcast %5 : f32 to vector<2x8xf32>
    %52 = arith.mulf %50, %51 : vector<2x8xf32>
    %53 = math.tanh %52 : vector<2x8xf32>
    %cst_31 = arith.constant 1.000000e+01 : f32
    %54 = vector.broadcast %cst_31 : f32 to vector<2x8xf32>
    %55 = arith.mulf %54, %53 : vector<2x8xf32>
    %cst_32 = arith.constant -1.000000e+09 : f32
    %56 = vector.broadcast %cst_32 : f32 to vector<2x8xf32>
    %57 = arith.select %7, %55, %56 : vector<2x8xi1>, vector<2x8xf32>
    %cst_33 = arith.constant dense<0xFF800000> : vector<2xf32>
    %58 = vector.multi_reduction <maximumf>, %57, %cst_33 [1] : vector<2x8xf32> to vector<2xf32>
    %59 = vector.shape_cast %58 : vector<2xf32> to vector<2x1xf32>
    %60 = vector.broadcast %59 : vector<2x1xf32> to vector<2x8xf32>
    %61 = arith.subf %57, %60 : vector<2x8xf32>
    %62 = math.exp %61 : vector<2x8xf32>
    %cst_34 = arith.constant 0.000000e+00 : f32
    %63 = vector.broadcast %cst_34 : f32 to vector<2x8xf32>
    %64 = arith.select %7, %62, %63 : vector<2x8xi1>, vector<2x8xf32>
    %cst_35 = arith.constant dense<0.000000e+00> : vector<2xf32>
    %65 = vector.multi_reduction <add>, %64, %cst_35 [1] : vector<2x8xf32> to vector<2xf32>
    %66 = vector.shape_cast %65 : vector<2xf32> to vector<2x1xf32>
    %cst_36 = arith.constant 9.99999971E-10 : f32
    %67 = vector.broadcast %cst_36 : f32 to vector<2x1xf32>
    %68 = arith.maximumf %66, %67 : vector<2x1xf32>
    %69 = tpu.reciprocal %68 {approx = true} : vector<2x1xf32> -> vector<2x1xf32>
    %70 = vector.broadcast %69 : vector<2x1xf32> to vector<2x8xf32>
    %71 = arith.mulf %64, %70 : vector<2x8xf32>
    %cst_37 = arith.constant 0.000000e+00 : f32
    %72 = vector.broadcast %cst_37 : f32 to vector<2x120xf32>
    %73 = tpu.concatenate %71, %72 in 1 : vector<2x8xf32>, vector<2x120xf32> -> vector<2x128xf32>
    %c0_38 = arith.constant 0 : index
    %c0_39 = arith.constant 0 : index
    %74 = vector.load %arg11[%c0_38, %c0_39] : memref<2x128xf32, #tpu.memory_space<vmem>>, vector<2x128xf32>
    tpu.vector_store %arg11[%c0_38, %c0_39], %73 {strides = array<i32>} : memref<2x128xf32, #tpu.memory_space<vmem>>, vector<2x128xf32>,
    %75 = tpu.iota {dimensions = array<i32: 1>} : vector<2x8xi32>
    %cst_40 = arith.constant dense<0xFF800000> : vector<2xf32>
    %76 = vector.multi_reduction <maximumf>, %71, %cst_40 [1] : vector<2x8xf32> to vector<2xf32>
    %77 = vector.shape_cast %76 : vector<2xf32> to vector<2x1xf32>
    %78 = vector.broadcast %77 : vector<2x1xf32> to vector<2x8xf32>
    %79 = arith.cmpf oge, %71, %78 : vector<2x8xf32>
    %c8_i32 = arith.constant 8 : i32
    %80 = vector.broadcast %c8_i32 : i32 to vector<2x8xi32>
    %81 = arith.select %79, %75, %80 : vector<2x8xi1>, vector<2x8xi32>
    %cst_41 = arith.constant dense<2147483647> : vector<2xi32>
    %82 = vector.multi_reduction <minsi>, %81, %cst_41 [1] : vector<2x8xi32> to vector<2xi32>
    %83 = vector.shape_cast %82 : vector<2xi32> to vector<2x1xi32>
    %84 = vector.broadcast %83 : vector<2x1xi32> to vector<2x8xi32>
    %85 = arith.cmpi eq, %75, %84 : vector<2x8xi32>
    %86 = arith.extui %85 : vector<2x8xi1> to vector<2x8xi32>
    %87 = arith.sitofp %86 : vector<2x8xi32> to vector<2x8xf32>
    %88 = vector.shape_cast %87 : vector<2x8xf32> to vector<2x8x1xf32>
    %89 = vector.broadcast %88 : vector<2x8x1xf32> to vector<2x8x8xf32>
    %90 = arith.mulf %89, %3 : vector<2x8x8xf32>
    %cst_42 = arith.constant dense<0.000000e+00> : vector<2x8xf32>
    %91 = vector.multi_reduction <add>, %90, %cst_42 [1] : vector<2x8x8xf32> to vector<2x8xf32>
    %92 = vector.shape_cast %87 : vector<2x8xf32> to vector<2x8x1xf32>
    %93 = vector.broadcast %92 : vector<2x8x1xf32> to vector<2x8x32xf32>
    %94 = arith.mulf %93, %0 : vector<2x8x32xf32>
    %cst_43 = arith.constant dense<0.000000e+00> : vector<2x32xf32>
    %95 = vector.multi_reduction <add>, %94, %cst_43 [1] : vector<2x8x32xf32> to vector<2x32xf32>
    %cst_44 = arith.constant 0.000000e+00 : f32
    %96 = vector.broadcast %cst_44 : f32 to vector<2x8xf32>
    %97 = arith.cmpf ogt, %91, %96 : vector<2x8xf32>
    %cst_45 = arith.constant dense<0.000000e+00> : vector<2x32xf32>
    %98 = vector.multi_reduction <add>, %1, %cst_45 [1] : vector<2x8x32xf32> to vector<2x32xf32>
    %cst_46 = arith.constant 8.000000e+00 : f32
    %99 = vector.broadcast %cst_46 : f32 to vector<2x32xf32>
    %100 = arith.divf %98, %99 : vector<2x32xf32>
    %c0_47 = arith.constant 0 : index
    %c0_48 = arith.constant 0 : index
    %101 = vector.load %arg8[%c0_47, %c0_48] : memref<64x32xf32, #tpu.memory_space<vmem>>, vector<32x32xf32>
    %cst_49 = arith.constant dense<0.000000e+00> : vector<2x32xf32>
    %102 = tpu.matmul %100, %101, %cst_49 {dimension_numbers = #tpu.dot_dimension_numbers<[1], [0], [0], [1], [0, 0, 1, 1], [], []>} : vector<2x32xf32>, vector<32x32xf32>, vector<2x32xf32> -> vector<2x32xf32>
    %c32 = arith.constant 32 : index
    %c0_50 = arith.constant 0 : index
    %103 = vector.load %arg8[%c32, %c0_50] : memref<64x32xf32, #tpu.memory_space<vmem>>, vector<32x32xf32>
    %cst_51 = arith.constant dense<0.000000e+00> : vector<2x32xf32>
    %104 = tpu.matmul %95, %103, %cst_51 {dimension_numbers = #tpu.dot_dimension_numbers<[1], [0], [0], [1], [0, 0, 1, 1], [], []>} : vector<2x32xf32>, vector<32x32xf32>, vector<2x32xf32> -> vector<2x32xf32>
    %105 = arith.addf %102, %104 : vector<2x32xf32>
    %c0_52 = arith.constant 0 : index
    %c0_53 = arith.constant 0 : index
    %106 = vector.load %arg9[%c0_52, %c0_53] : memref<32x96xf32, #tpu.memory_space<vmem>>, vector<32x96xf32>
    %c0_54 = arith.constant 0 : index
    %c0_55 = arith.constant 0 : index
    %107 = vector.load %arg10[%c0_54, %c0_55] : memref<32x32xf32, #tpu.memory_space<vmem>>, vector<32x32xf32>
    %108 = vector.shape_cast %1 : vector<2x8x32xf32> to vector<16x32xf32>
    %cst_56 = arith.constant dense<0.000000e+00> : vector<16x96xf32>
    %109 = tpu.matmul %108, %106, %cst_56 {dimension_numbers = #tpu.dot_dimension_numbers<[1], [0], [0], [1], [0, 0, 1, 1], [], []>} : vector<16x32xf32>, vector<32x96xf32>, vector<16x96xf32> -> vector<16x96xf32>
    %110 = vector.extract_strided_slice %109 {offsets = [0, 0], sizes = [16, 32], strides = [1, 1]} : vector<16x96xf32> to vector<16x32xf32>
    %111 = vector.shape_cast %110 : vector<16x32xf32> to vector<2x8x32xf32>
    %112 = vector.extract_strided_slice %109 {offsets = [0, 32], sizes = [16, 32], strides = [1, 1]} : vector<16x96xf32> to vector<16x32xf32>
    %113 = vector.shape_cast %112 : vector<16x32xf32> to vector<2x8x32xf32>
    %114 = vector.extract_strided_slice %109 {offsets = [0, 64], sizes = [16, 32], strides = [1, 1]} : vector<16x96xf32> to vector<16x32xf32>
    %115 = vector.shape_cast %114 : vector<16x32xf32> to vector<2x8x32xf32>
    %116 = vector.shape_cast %105 : vector<2x32xf32> to vector<2x1x32xf32>
    "tpu.trace_start"() <{level = 10 : i32, message = "bqd,bnd->bqn"}> : () -> ()
    %cst_57 = arith.constant dense<0.000000e+00> : vector<2x1x8xf32>
    %117 = tpu.matmul %116, %111, %cst_57 {dimension_numbers = #tpu.dot_dimension_numbers<[2], [2], [1], [1], [0, 0, 0, 1, 1, 1], [0], [0]>} : vector<2x1x32xf32>, vector<2x8x32xf32>, vector<2x1x8xf32> -> vector<2x1x8xf32>
    "tpu.trace_stop"() : () -> ()
    %118 = vector.shape_cast %117 : vector<2x1x8xf32> to vector<2x8xf32>
    %119 = vector.broadcast %5 : f32 to vector<2x8xf32>
    %120 = arith.mulf %118, %119 : vector<2x8xf32>
    %cst_58 = arith.constant -1.000000e+09 : f32
    %121 = vector.broadcast %cst_58 : f32 to vector<2x8xf32>
    %122 = arith.select %97, %120, %121 : vector<2x8xi1>, vector<2x8xf32>
    %cst_59 = arith.constant dense<0xFF800000> : vector<2xf32>
    %123 = vector.multi_reduction <maximumf>, %122, %cst_59 [1] : vector<2x8xf32> to vector<2xf32>
    %124 = vector.shape_cast %123 : vector<2xf32> to vector<2x1xf32>
    %125 = vector.broadcast %124 : vector<2x1xf32> to vector<2x8xf32>
    %126 = arith.subf %122, %125 : vector<2x8xf32>
    %127 = math.exp %126 : vector<2x8xf32>
    %cst_60 = arith.constant 0.000000e+00 : f32
    %128 = vector.broadcast %cst_60 : f32 to vector<2x8xf32>
    %129 = arith.select %97, %127, %128 : vector<2x8xi1>, vector<2x8xf32>
    %cst_61 = arith.constant dense<0.000000e+00> : vector<2xf32>
    %130 = vector.multi_reduction <add>, %129, %cst_61 [1] : vector<2x8xf32> to vector<2xf32>
    %131 = vector.shape_cast %130 : vector<2xf32> to vector<2x1xf32>
    %cst_62 = arith.constant 9.99999971E-10 : f32
    %132 = vector.broadcast %cst_62 : f32 to vector<2x1xf32>
    %133 = arith.maximumf %131, %132 : vector<2x1xf32>
    %134 = tpu.reciprocal %133 {approx = true} : vector<2x1xf32> -> vector<2x1xf32>
    %135 = vector.broadcast %134 : vector<2x1xf32> to vector<2x8xf32>
    %136 = arith.mulf %129, %135 : vector<2x8xf32>
    %137 = vector.shape_cast %136 : vector<2x8xf32> to vector<2x1x8xf32>
    "tpu.trace_start"() <{level = 10 : i32, message = "bqn,bnd->bqd"}> : () -> ()
    %cst_63 = arith.constant dense<0.000000e+00> : vector<2x1x32xf32>
    %138 = tpu.matmul %137, %113, %cst_63 {dimension_numbers = #tpu.dot_dimension_numbers<[2], [1], [1], [2], [0, 0, 0, 1, 1, 2], [0], [0]>} : vector<2x1x8xf32>, vector<2x8x32xf32>, vector<2x1x32xf32> -> vector<2x1x32xf32>
    "tpu.trace_stop"() : () -> ()
    %139 = vector.shape_cast %138 : vector<2x1x32xf32> to vector<2x32xf32>
    %cst_64 = arith.constant dense<0.000000e+00> : vector<2x32xf32>
    %140 = tpu.matmul %139, %107, %cst_64 {dimension_numbers = #tpu.dot_dimension_numbers<[1], [0], [0], [1], [0, 0, 1, 1], [], []>} : vector<2x32xf32>, vector<32x32xf32>, vector<2x32xf32> -> vector<2x32xf32>
    %141 = vector.shape_cast %140 : vector<2x32xf32> to vector<2x1x32xf32>
    "tpu.trace_start"() <{level = 10 : i32, message = "bqd,bnd->bqn"}> : () -> ()
    %cst_65 = arith.constant dense<0.000000e+00> : vector<2x1x8xf32>
    %142 = tpu.matmul %141, %115, %cst_65 {dimension_numbers = #tpu.dot_dimension_numbers<[2], [2], [1], [1], [0, 0, 0, 1, 1, 1], [0], [0]>} : vector<2x1x32xf32>, vector<2x8x32xf32>, vector<2x1x8xf32> -> vector<2x1x8xf32>
    "tpu.trace_stop"() : () -> ()
    %143 = vector.shape_cast %142 : vector<2x1x8xf32> to vector<2x8xf32>
    %144 = vector.broadcast %5 : f32 to vector<2x8xf32>
    %145 = arith.mulf %143, %144 : vector<2x8xf32>
    %146 = math.tanh %145 : vector<2x8xf32>
    %cst_66 = arith.constant 1.000000e+01 : f32
    %147 = vector.broadcast %cst_66 : f32 to vector<2x8xf32>
    %148 = arith.mulf %147, %146 : vector<2x8xf32>
    %cst_67 = arith.constant -1.000000e+09 : f32
    %149 = vector.broadcast %cst_67 : f32 to vector<2x8xf32>
    %150 = arith.select %97, %148, %149 : vector<2x8xi1>, vector<2x8xf32>
    %cst_68 = arith.constant dense<0xFF800000> : vector<2xf32>
    %151 = vector.multi_reduction <maximumf>, %150, %cst_68 [1] : vector<2x8xf32> to vector<2xf32>
    %152 = vector.shape_cast %151 : vector<2xf32> to vector<2x1xf32>
    %153 = vector.broadcast %152 : vector<2x1xf32> to vector<2x8xf32>
    %154 = arith.subf %150, %153 : vector<2x8xf32>
    %155 = math.exp %154 : vector<2x8xf32>
    %cst_69 = arith.constant 0.000000e+00 : f32
    %156 = vector.broadcast %cst_69 : f32 to vector<2x8xf32>
    %157 = arith.select %97, %155, %156 : vector<2x8xi1>, vector<2x8xf32>
    %cst_70 = arith.constant dense<0.000000e+00> : vector<2xf32>
    %158 = vector.multi_reduction <add>, %157, %cst_70 [1] : vector<2x8xf32> to vector<2xf32>
    %159 = vector.shape_cast %158 : vector<2xf32> to vector<2x1xf32>
    %cst_71 = arith.constant 9.99999971E-10 : f32
    %160 = vector.broadcast %cst_71 : f32 to vector<2x1xf32>
    %161 = arith.maximumf %159, %160 : vector<2x1xf32>
    %162 = tpu.reciprocal %161 {approx = true} : vector<2x1xf32> -> vector<2x1xf32>
    %163 = vector.broadcast %162 : vector<2x1xf32> to vector<2x8xf32>
    %164 = arith.mulf %157, %163 : vector<2x8xf32>
    %cst_72 = arith.constant 0.000000e+00 : f32
    %165 = vector.broadcast %cst_72 : f32 to vector<2x120xf32>
    %166 = tpu.concatenate %164, %165 in 1 : vector<2x8xf32>, vector<2x120xf32> -> vector<2x128xf32>
    %c0_73 = arith.constant 0 : index
    %c0_74 = arith.constant 0 : index
    %167 = vector.load %arg12[%c0_73, %c0_74] : memref<2x128xf32, #tpu.memory_space<vmem>>, vector<2x128xf32>
    tpu.vector_store %arg12[%c0_73, %c0_74], %166 {strides = array<i32>} : memref<2x128xf32, #tpu.memory_space<vmem>>, vector<2x128xf32>,
    %168 = tpu.iota {dimensions = array<i32: 1>} : vector<2x8xi32>
    %cst_75 = arith.constant dense<0xFF800000> : vector<2xf32>
    %169 = vector.multi_reduction <maximumf>, %164, %cst_75 [1] : vector<2x8xf32> to vector<2xf32>
    %170 = vector.shape_cast %169 : vector<2xf32> to vector<2x1xf32>
    %171 = vector.broadcast %170 : vector<2x1xf32> to vector<2x8xf32>
    %172 = arith.cmpf oge, %164, %171 : vector<2x8xf32>
    %c8_i32_76 = arith.constant 8 : i32
    %173 = vector.broadcast %c8_i32_76 : i32 to vector<2x8xi32>
    %174 = arith.select %172, %168, %173 : vector<2x8xi1>, vector<2x8xi32>
    %cst_77 = arith.constant dense<2147483647> : vector<2xi32>
    %175 = vector.multi_reduction <minsi>, %174, %cst_77 [1] : vector<2x8xi32> to vector<2xi32>
    %176 = vector.shape_cast %175 : vector<2xi32> to vector<2x1xi32>
    %c0_78 = arith.constant 0 : index
    %c0_79 = arith.constant 0 : index
    %177 = vector.load %arg13[%c0_78, %c0_79] : memref<2x1xi32, #tpu.memory_space<vmem>>, vector<2x1xi32>
    tpu.vector_store %arg13[%c0_78, %c0_79], %83 {strides = array<i32>} : memref<2x1xi32, #tpu.memory_space<vmem>>, vector<2x1xi32>,
    %c0_80 = arith.constant 0 : index
    %c0_81 = arith.constant 0 : index
    %178 = vector.load %arg14[%c0_80, %c0_81] : memref<2x1xi32, #tpu.memory_space<vmem>>, vector<2x1xi32>
    tpu.vector_store %arg14[%c0_80, %c0_81], %176 {strides = array<i32>} : memref<2x1xi32, #tpu.memory_space<vmem>>, vector<2x1xi32>,
    return
  }
  func.func @transform_0(%arg0: i32) -> (i32, i32, i32) {
    %c0_i32 = arith.constant 0 : i32
    %c0_i32_0 = arith.constant 0 : i32
    %c0_i32_1 = arith.constant 0 : i32
    return %arg0, %c0_i32, %c0_i32_0 : i32, i32, i32
  }
  func.func @transform_1(%arg0: i32) -> (i32, i32, i32) {
    %c0_i32 = arith.constant 0 : i32
    %c0_i32_0 = arith.constant 0 : i32
    %c0_i32_1 = arith.constant 0 : i32
    return %arg0, %c0_i32, %c0_i32_0 : i32, i32, i32
  }
  func.func @transform_2(%arg0: i32) -> (i32, i32) {
    %c0_i32 = arith.constant 0 : i32
    %c0_i32_0 = arith.constant 0 : i32
    return %arg0, %c0_i32 : i32, i32
  }
  func.func @transform_3(%arg0: i32) -> (i32, i32, i32) {
    %c0_i32 = arith.constant 0 : i32
    %c0_i32_0 = arith.constant 0 : i32
    %c0_i32_1 = arith.constant 0 : i32
    return %arg0, %c0_i32, %c0_i32_0 : i32, i32, i32
  }
  func.func @transform_4(%arg0: i32) -> (i32, i32) {
    %c0_i32 = arith.constant 0 : i32
    %c0_i32_0 = arith.constant 0 : i32
    %c0_i32_1 = arith.constant 0 : i32
    return %c0_i32, %c0_i32_0 : i32, i32
  }
  func.func @transform_5(%arg0: i32) -> (i32, i32) {
    %c0_i32 = arith.constant 0 : i32
    %c0_i32_0 = arith.constant 0 : i32
    %c0_i32_1 = arith.constant 0 : i32
    return %c0_i32, %c0_i32_0 : i32, i32
  }
  func.func @transform_6(%arg0: i32) -> (i32, i32) {
    %c0_i32 = arith.constant 0 : i32
    %c0_i32_0 = arith.constant 0 : i32
    %c0_i32_1 = arith.constant 0 : i32
    return %c0_i32, %c0_i32_0 : i32, i32
  }
  func.func @transform_7(%arg0: i32) -> (i32, i32) {
    %c0_i32 = arith.constant 0 : i32
    %c0_i32_0 = arith.constant 0 : i32
    %c0_i32_1 = arith.constant 0 : i32
    return %c0_i32, %c0_i32_0 : i32, i32
  }
  func.func @transform_8(%arg0: i32) -> (i32, i32) {
    %c0_i32 = arith.constant 0 : i32
    %c0_i32_0 = arith.constant 0 : i32
    %c0_i32_1 = arith.constant 0 : i32
    return %c0_i32, %c0_i32_0 : i32, i32
  }
  func.func @transform_9(%arg0: i32) -> (i32, i32) {
    %c0_i32 = arith.constant 0 : i32
    %c0_i32_0 = arith.constant 0 : i32
    %c0_i32_1 = arith.constant 0 : i32
    return %c0_i32, %c0_i32_0 : i32, i32
  }
  func.func @transform_10(%arg0: i32) -> (i32, i32) {
    %c0_i32 = arith.constant 0 : i32
    %c0_i32_0 = arith.constant 0 : i32
    return %arg0, %c0_i32 : i32, i32
  }
  func.func @transform_11(%arg0: i32) -> (i32, i32) {
    %c0_i32 = arith.constant 0 : i32
    %c0_i32_0 = arith.constant 0 : i32
    return %arg0, %c0_i32 : i32, i32
  }
  func.func @transform_12(%arg0: i32) -> (i32, i32) {
    %c0_i32 = arith.constant 0 : i32
    %c0_i32_0 = arith.constant 0 : i32
    return %arg0, %c0_i32 : i32, i32
  }
  func.func @transform_13(%arg0: i32) -> (i32, i32) {
    %c0_i32 = arith.constant 0 : i32
    %c0_i32_0 = arith.constant 0 : i32
    return %arg0, %c0_i32 : i32, i32
  }
}

</mosaic_0001>

<bundles_post_ra>
// kernel: tpu_custom_call.1
= control target key start
LH: loop header
LB: loop body
LE: loop exit
PB: predicated region body
PF: predicated region fallthrough
CT: control target
= control target key end

     0   :  { %19 = vsyncpa [#allocation3], 0  ;;  %s2943_s0 = inlined_call_operand.hbm [shape: f32[2,8,32], index: 0, kind: input, shape index: {}]   ;;  %s2944_s1 = inlined_call_operand.hbm [shape: f32[2,8,32], index: 1, kind: input, shape index: {}]   ;;  %s2945_s2 = inlined_call_operand.vmem [shape: f32[2,8], index: 2, kind: input, shape index: {}]   ;;  %s2946_s3 = inlined_call_operand.hbm [shape: f32[2,8,8], index: 3, kind: input, shape index: {}]   ;;  %s2947_s4 = inlined_call_operand.vmem [shape: f32[32,32], index: 4, kind: input, shape index: {}]   ;;  %s2948_s5 = inlined_call_operand.vmem [shape: f32[32,96], index: 5, kind: input, shape index: {}]   ;;  %s2949_s6 = inlined_call_operand.vmem [shape: f32[32,32], index: 6, kind: input, shape index: {}]   ;;  %s2950_s7 = inlined_call_operand.vmem [shape: f32[64,32], index: 7, kind: input, shape index: {}]   ;;  %s2951_s8 = inlined_call_operand.hbm [shape: f32[32,96], index: 8, kind: input, shape index: {}]   ;;  %s2952_s9 = inlined_call_operand.vmem [shape: f32[32,32], index: 9, kind: input, shape index: {}]   ;;  %s2953_s10 = inlined_call_operand.hbm [shape: f32[2,128], index: 10, kind: output, shape index: {0}]   ;;  %s2954_s11 = inlined_call_operand.hbm [shape: f32[2,128], index: 11, kind: output, shape index: {1}]   ;;  %s2955_s12 = inlined_call_operand.vmem [shape: s32[2,1], index: 12, kind: output, shape index: {2}]   ;;  %s2956_s13 = inlined_call_operand.vmem [shape: s32[2,1], index: 13, kind: output, shape index: {3}]  }
   0x1   :  { %20 = vsyncpa [#allocation6], 0 }
   0x2   :  { %21 = vsyncpa [#allocation9], 0 }
   0x3   :  { %22 = vsyncpa [#allocation4], 0 }
   0x4   :  { %23 = vsyncpa [#allocation12], 0  ;;  %s2471_s25 = smov [#allocation5]   ;;  %s2472_s27 = smov [#allocation2]  }
   0x5   :  { %s41_s26 = sshll.u32 %s2471_s25, 4  ;;  %s29_s28 = sshll.u32 %s2472_s27, 4  ;;  %s42_s26 = int_to_ptr.vmem [resolvable:$true] %s41_s26  ;;  %s2555_s28 = int_to_ptr.vmem [resolvable:$true] %s29_s28 }
   0x6   :  { %s2329_s14 = scalar_lea.hbm %s2944_s1, 256 }
   0x7   :  { %p2330_p0 = scmp.ne.s32.totalorder %s2944_s1, %s2329_s14  ;;  %p2333_p1 = scmp.lt.u32.totalorder %s2329_s14, %s2944_s1 }
   0x9   :  { %p2335_p2 = pnand %p2333_p1, %p2330_p0 }
   0xb   :  { %2338 = shalt.err (!%p2335_p2)
}
   0xc   :  { %s2339_s19 = scalar_lea.vmem %s42_s26, 256  ;;  %p2344_p4 = scmp.lt.s32.totalorder %s42_s26, %s42_s26 }
   0xd   :  { %p2340_p3 = scmp.ne.s32.totalorder %s42_s26, %s2339_s19  ;;  %p2345_p5 = scmp.lt.s32.totalorder %s2339_s19, %s2339_s19 }
   0xf   :  { %p2346_p6 = por %p2345_p5, %p2344_p4 }
  0x11   :  { %p2347_p7 = pnand %p2346_p6, %p2340_p3 }
  0x13   :  { %2350 = shalt.err (!%p2347_p7)
}
  0x14   :  { %s2473_s20 = smov 128   ;;  %s2474_s21 = smov 8  }
  0x15   :  { %47 = dma.hbm_to_vmem [thread:$0]  %s2944_s1, 256, %s42_s26, [#allocation6], %s2473_s20, %s2473_s20, %s2474_s21  }
  0x16   :  { %s2351_s27 = scalar_lea.hbm %s2943_s0, 256 }
  0x17   :  { %p2352_p8 = scmp.ne.s32.totalorder %s2943_s0, %s2351_s27  ;;  %p2355_p9 = scmp.lt.u32.totalorder %s2351_s27, %s2943_s0 }
  0x19   :  { %p2357_p10 = pnand %p2355_p9, %p2352_p8 }
  0x1b   :  { %2360 = shalt.err (!%p2357_p10)
}
  0x1c   :  { %s2361_s16 = scalar_lea.vmem %s2555_s28, 256  ;;  %p2366_p12 = scmp.lt.s32.totalorder %s2555_s28, %s2555_s28 }
  0x1d   :  { %p2362_p11 = scmp.ne.s32.totalorder %s2555_s28, %s2361_s16  ;;  %p2367_p13 = scmp.lt.s32.totalorder %s2361_s16, %s2361_s16 }
  0x1f   :  { %p2368_p0 = por %p2367_p13, %p2366_p12 }
  0x21   :  { %p2369_p1 = pnand %p2368_p0, %p2362_p11 }
  0x23   :  { %2372 = shalt.err (!%p2369_p1)
}
  0x24   :  { %35 = dma.hbm_to_vmem [thread:$0]  %s2943_s0, 256, %s2555_s28, [#allocation3], %s2473_s20, %s2473_s20, %s2474_s21  }
  0x25   :  { %s2475_s17 = smov [#allocation7]   ;;  %s2476_s19 = smov [#allocation8]  }
  0x26   :  { %s55_s18 = sshll.u32 %s2475_s17, 4  ;;  %s75_s22 = sshll.u32 %s2476_s19, 4  ;;  %s56_s18 = int_to_ptr.vmem [resolvable:$true] %s55_s18  ;;  %s2592_s22 = int_to_ptr.vmem [resolvable:$true] %s75_s22 }
  0x27   :  { %s2373_s25 = scalar_lea.hbm %s2946_s3, 256 }
  0x28   :  { %p2374_p2 = scmp.ne.s32.totalorder %s2946_s3, %s2373_s25  ;;  %p2377_p3 = scmp.lt.u32.totalorder %s2373_s25, %s2946_s3 }
  0x2a   :  { %p2379_p4 = pnand %p2377_p3, %p2374_p2 }
  0x2c   :  { %2382 = shalt.err (!%p2379_p4)
}
  0x2d   :  { %s2383_s0 = scalar_lea.vmem %s56_s18, 256  ;;  %p2388_p6 = scmp.lt.s32.totalorder %s56_s18, %s56_s18 }
  0x2e   :  { %p2384_p5 = scmp.ne.s32.totalorder %s56_s18, %s2383_s0  ;;  %p2389_p7 = scmp.lt.s32.totalorder %s2383_s0, %s2383_s0 }
  0x30   :  { %p2390_p8 = por %p2389_p7, %p2388_p6 }
  0x32   :  { %p2391_p9 = pnand %p2390_p8, %p2384_p5 }
  0x34   :  { %2394 = shalt.err (!%p2391_p9)
}
  0x35   :  { %61 = dma.hbm_to_vmem [thread:$0]  %s2946_s3, 256, %s56_s18, [#allocation6], %s2473_s20, %s2473_s20, %s2474_s21  }
  0x36   :  { %s2395_s26 = scalar_lea.hbm %s2951_s8, 512 }
  0x37   :  { %p2396_p10 = scmp.ne.s32.totalorder %s2951_s8, %s2395_s26  ;;  %p2399_p11 = scmp.lt.u32.totalorder %s2395_s26, %s2951_s8 }
  0x39   :  { %p2401_p12 = pnand %p2399_p11, %p2396_p10 }
  0x3b   :  { %2404 = shalt.err (!%p2401_p12)
}
  0x3c   :  { %s2405_s25 = scalar_lea.vmem %s2592_s22, 512  ;;  %p2410_p0 = scmp.lt.s32.totalorder %s2592_s22, %s2592_s22 }
  0x3d   :  { %p2406_p13 = scmp.ne.s32.totalorder %s2592_s22, %s2405_s25  ;;  %p2411_p1 = scmp.lt.s32.totalorder %s2405_s25, %s2405_s25 }
  0x3f   :  { %p2412_p2 = por %p2411_p1, %p2410_p0 }
  0x41   :  { %p2413_p3 = pnand %p2412_p2, %p2406_p13 }
  0x43   :  { %2416 = shalt.err (!%p2413_p3)
}
  0x44   :  { %81 = dma.hbm_to_vmem [thread:$0]  %s2951_s8, 512, %s2592_s22, [#allocation9], %s2473_s20, %s2473_s20, %s2474_s21  }
  0x45   :  { %2461 = dma.done.wait [#allocation3], 256  }
  0x46   :  { %2462 = vsyncadd [#allocation3], 4294967040 }
  0x47   :  { %2463 = dma.done.wait [#allocation6], 512  }
  0x48   :  { %2464 = vsyncadd [#allocation6], 4294966784 }
  0x49   :  { %2465 = dma.done.wait [#allocation9], 512  }
  0x4a   :  { %2466 = vsyncadd [#allocation9], 4294966784  ;;  %v2477_v0 = vmov 0.0|0.0   ;;  %vm2478_vm0 = vmmov 0   ;;  %v2479_v1 = vmov 0.0   ;;  %v202_v2 = vld [vmem:[%s2948_s5] sm:$0xff]  ;;  %v295_v35 = vlaneseq }
  0x4b   :  { %2239 = vmatprep.subr.bf16.mxu0 %v2477_v0  ;;  %2110 = vmatprep.mubr.msk.f32.mxu0 %vm2478_vm0, %v2479_v1  ;;  %v203_v3 = vld [vmem:[%s2948_s5 + $0x8] sm:$0xff]  ;;  %v204_v4 = vld [vmem:[%s2948_s5 + $0x10] sm:$0xff]  ;;  %vm104_vm1 = vcmask 261120   ;;  %v205_v6 = vld [vmem:[%s2948_s5 + $0x18] sm:$0xff]  ;;  %vm128_vm2 = vcmask 1041409   ;;  %s2482_s19 = smov 64  }
  0x4c   :  { %v2245_v5 = vpack.c.bf16 %v203_v3, %v202_v2  ;;  %v122_v7 = vld [vmem:[%s2947_s4] sm:$0xff]  ;;  %v123_v8 = vld [vmem:[%s2947_s4 + $0x8] sm:$0xff]  ;;  %v2249_v9 = vpack.c.bf16 %v205_v6, %v204_v4  ;;  %v124_v13 = vld [vmem:[%s2947_s4 + $0x10] sm:$0xff]  ;;  %v2480_v33 = vmov 1966171168   ;;  %v2679_v39 = vshrl.u32 %v295_v35, 7 }
  0x4d   :  { %v2240_v10 = vpack.c.bf16 %v123_v8, %v122_v7  ;;  %v2650_v11 = vld [vmem:[#allocation2] sm:$0xff]  ;;  %v2652_v12 = vld [vmem:[#allocation2 + $0x8] sm:$0xff]  ;;  %v125_v16 = vld [vmem:[%s2947_s4 + $0x18] sm:$0xff]  ;;  %v293_v34 = vunpack.c.l.s4 %v2480_v33  ;;  %s2481_s4 = smov 96   ;;  %vm472_vm4 = vcmask 58368   ;;  %vm512_vm5 = vcmask 64512  }
  0x4e   :  { %2246 = vmatprep.subr.bf16.mxu1 %v2245_v5  ;;  %v105_v14 = vsel %vm104_vm1, %v2650_v11, 0.0  ;;  %2121 = vmatprep.mubr.msk.f32.mxu1 %vm104_vm1, %v2650_v11  ;;  %v112_v15 = vsel %vm104_vm1, %v2652_v12, 0.0  ;;  %v2243_v19 = vpack.c.bf16 %v125_v16, %v124_v13  ;;  %v2704_v52 = vld [vmem:[%s2945_s2] sm:$0x3]  ;;  %vm1969_vm8 = vcmask 1024  }
  0x4f   :  { %2248 = vmatpush3.bf16.msra.mxu1 %v2245_v5  ;;  %2241 = vmatpush3.bf16.msra.mxu0 %v2240_v10  ;;  %v106_v17 = vrot.slane %v105_v14, 4  ;;  %v113_v18 = vrot.slane %v112_v15, 4  ;;  %v294_v38 = vunpack.c.0.s8 %v293_v34  ;;  %vm103_vm3 = vcmp.gt.f32.partialorder %v2704_v52, 0.0  ;;  %v206_v8 = vld [vmem:[%s2949_s6] sm:$0xff] }
  0x50   :  { %2250 = vmatprep.subr.bf16.mxu1 %v2249_v9  ;;  %2242 = vmatprep.subr.bf16.mxu0 %v2477_v0 }
  0x51   :  { %v107_v20 = vadd.f32 %v106_v17, %v105_v14  ;;  %v114_v21 = vadd.f32 %v113_v18, %v112_v15  ;;  %v2687_v40 = vsub.s32 %v294_v38, %v2679_v39  ;;  %v208_v18 = vld [vmem:[%s2949_s6 + $0x10] sm:$0xff] }
  0x53   :  { %2252 = vmatpush3.bf16.msra.mxu1 %v2249_v9  ;;  %v108_v22 = vrot.slane %v107_v20, 2  ;;  %v115_v23 = vrot.slane %v114_v21, 2  ;;  %2244 = vmatpush3.bf16.msra.mxu0 %v2243_v19  ;;  %v207_v9 = vld [vmem:[%s2949_s6 + $0x8] sm:$0xff]  ;;  %v209_v19 = vld [vmem:[%s2949_s6 + $0x18] sm:$0xff]  ;;  %s2484_s6 = smov [#allocation11]  }
  0x54   :  { %2124 = vmatprep.subr.mxu0 %v2479_v1  ;;  %2129 = vmatprep.subr.mxu1 %v2479_v1  ;;  %v2254_v13 = vpack.c.bf16 %v207_v9, %v206_v8  ;;  %s1988_s20 = sshll.u32 %s2484_s6, 4  ;;  %s1989_s20 = int_to_ptr.vmem [resolvable:$true] %s1988_s20 }
  0x55   :  { %v109_v24 = vadd.f32 %v108_v22, %v107_v20  ;;  %v116_v25 = vadd.f32 %v115_v23, %v114_v21  ;;  %v2257_v20 = vpack.c.bf16 %v209_v19, %v208_v18  ;;  %v965_v18 = vsub.s32 0, %v2679_v39  ;;  %v1031_v19 = vld [vmem:[%s2950_s7 + $0x20] sm:$0xff] }
  0x56   :  { %2122 = vmatmul.mubr.msk.f32.vlgmr.msra.gmra.mrb[0].mxu1 %vm104_vm1, %v2652_v12 }
  0x57   :  { %v110_v26 = vrot.slane %v109_v24, 1  ;;  %v117_v27 = vrot.slane %v116_v25, 1  ;;  %2131 = vmatprep.mubr.msk.f32.mxu1 %vm2478_vm0, %v2479_v1 }
  0x59   :  { %v111_v28 = vadd.f32 %v110_v26, %v109_v24  ;;  %v118_v29 = vadd.f32 %v117_v27, %v116_v25 }
  0x5b   :  { %v120_v30 = vmul.f32 0.125, %v111_v28  ;;  %v121_v31 = vmul.f32 0.125, %v118_v29 }
  0x5d   :  { %v129_v32 = vsel %vm128_vm2, %v121_v31, %v120_v30 }
  0x5e   :  { %2111 = vmatmul.mubr.msk.f32.vlgmr.msra.gmra.mrb[0].mxu0 %vm104_vm1, %v129_v32 }
  0x5f   :  { %2126 = vmatprep.mubr.msk.f32.mxu0 %vm2478_vm0, %v2479_v1 }
 0x129   :  { %v2123_v36 = vpop.f32.mrb[0].mxu1 }
 0x12a   :  { %585 = vrot.lane.b32.xlu1 %v2123_v36, %s2481_s4  ;;  %v282_v37 = vpop.f32.mrb[1].mxu1  ;;  %2130 = vmatpush3.xpose.msk.msra.mxu1 %vm104_vm1, %v2123_v36 }
 0x12b   :  { %2125 = vmatpush3.xpose.msk.msra.mxu0 %vm104_vm1, %v282_v37  ;;  %2139 = vmatprep.subr.mxu1 %v2479_v1 }
 0x12c   :  { %2134 = vmatprep.subr.mxu0 %v2479_v1 }
 0x12e   :  { %509 = vrot.lane.b32.xlu1 %v282_v37, %s2481_s4 }
 0x131   :  { %v198_v41 = vpop.f32.mrb[0].mxu0 }
 0x132   :  { %v298_v42 = vrot.slane %v198_v41, %v2687_v40  ;;  %v2112_v43 = vpop.f32.mrb[1].mxu0  ;;  %835 = vrot.lane.b32.xlu1 %v2123_v36, %s2482_s19 }
 0x134   :  { %v299_v44 = vcombine.high %v298_v42, %v298_v42  ;;  %v306_v45 = vrot.slane %v298_v42, %v2687_v40 }
 0x136   :  { %v313_v46 = vrot.slane %v299_v44, %v2687_v40  ;;  %2127 = vmatmul.mubr.msk.f32.vlgmr.msra.gmra.mrb[2].mxu0 %vm104_vm1, %v306_v45 }
 0x137   :  { %2136 = vmatprep.mubr.msk.f32.mxu0 %vm2478_vm0, %v2479_v1 }
 0x138   :  { %2132 = vmatmul.mubr.msk.f32.vlgmr.msra.gmra.mrb[2].mxu1 %vm104_vm1, %v313_v46 }
 0x139   :  { %2141 = vmatprep.mubr.msk.f32.mxu1 %vm2478_vm0, %v2479_v1 }
 0x19c   :  { %v586_v47 = vpop.permute.xlu1 %585 }
 0x19d   :  { %2140 = vmatpush3.msra.mxu1 %v586_v47 }
 0x19e   :  { %2155 = vmatprep.subr.mxu1 %v2479_v1 }
 0x1a0   :  { %v510_v48 = vpop.permute.xlu1 %509 }
 0x1a1   :  { %2135 = vmatpush3.msra.mxu0 %v510_v48 }
 0x1a2   :  { %2253 = vmatprep.subr.bf16.mxu0 %v2477_v0 }
 0x1a4   :  { %v836_v32 = vpop.permute.xlu1 %835 }
 0x209   :  { %v385_v49 = vpop.f32.mrb[2].mxu0 }
 0x20a   :  { %v2128_v50 = vpop.f32.mrb[3].mxu0  ;;  %v464_v55 = vmul.f32 0.17677669, %v385_v49 }
 0x20b   :  { %v460_v51 = vpop.f32.mrb[2].mxu1 }
 0x20c   :  { %v465_v53 = vmul.f32 0.17677669, %v460_v51  ;;  %v2133_v54 = vpop.f32.mrb[3].mxu1 }
 0x20e   :  { %v468_v56 = vrot.slane %v465_v53, 7 }
 0x210   :  { %v469_v57 = vsel %vm128_vm2, %v468_v56, %v464_v55 }
 0x211   :  { %v471_v58 = vsel %vm103_vm3, %v469_v57, -1e+09 }
 0x212   :  { %v473_v59 = vsel %vm472_vm4, %v471_v58, -inf }
 0x213   :  { %474 = vmax.xlane.f32.xlu0 %v473_v59 }
 0x2a0   :  { %v475_v60 = vpop.xlane.xlu0 %474 }
 0x2a1   :  { %v476_v61 = vsub.f32 %v471_v58, %v475_v60 }
 0x2a3   :  { %v477_v62 = vmul.f32 1.442695, %v476_v61 }
 0x2a5   :  { %2301 = vpow2.f32 %v477_v62 }
 0x2af   :  { %v2302_v63 = vpop.eup %2301 }
 0x2b0   :  { %v479_v2 = vsel %vm103_vm3, %v2302_v63, 0.0 }
 0x2b1   :  { %v480_v3 = vsel %vm472_vm4, %v479_v2, 0.0 }
 0x2b2   :  { %481 = vadd.xlane.f32.xlu0 %v480_v3 }
 0x2c8   :  { %759 = vrot.lane.b32.xlu0 %v282_v37, %s2482_s19 }
 0x33f   :  { %v482_v4 = vpop.xlane.xlu0 %481 }
 0x340   :  { %v483_v5 = vmax.f32 %v482_v4, 1e-09 }
 0x342   :  { %2303 = vrcp.f32 %v483_v5 }
 0x343   :  { %v760_v17 = vpop.permute.xlu0 %759 }
 0x34c   :  { %v2304_v6 = vpop.eup %2303 }
 0x34d   :  { %v485_v7 = vmul.f32 %v2304_v6, %v479_v2  ;;  %v2762_v2 = vand.u32 127, %v295_v35 }
 0x34f   :  { %v493_v10 = vrot.slane %v485_v7, %v2687_v40 }
 0x351   :  { %v501_v14 = vrot.slane %v493_v10, %v2687_v40  ;;  %v494_v15 = vcombine.high %v493_v10, %v493_v10 }
 0x353   :  { %2137 = vmatmul.mubr.msk.f32.vlgmr.msra.gmra.mrb[4].mxu0 %vm512_vm5, %v501_v14  ;;  %v508_v16 = vrot.slane %v494_v15, %v2687_v40 }
 0x354   :  { %2255 = vmatpush3.bf16.msra.mxu0 %v2254_v13  ;;  %2152 = vmatprep.mubr.msk.f32.mxu0 %vm2478_vm0, %v2479_v1 }
 0x355   :  { %2142 = vmatmul.mubr.msk.f32.vlgmr.msra.gmra.mrb[4].mxu1 %vm512_vm5, %v508_v16  ;;  %2256 = vmatprep.subr.bf16.mxu0 %v2477_v0 }
 0x356   :  { %2156 = vmatpush3.xpose.msk.msra.mxu1 %vm104_vm1, %v760_v17  ;;  %2157 = vmatprep.mubr.msk.f32.mxu1 %vm2478_vm0, %v2479_v1  ;;  %v972_v17 = vsub.s32 1, %v2679_v39 }
 0x357   :  { %2160 = vmatprep.subr.mxu1 %v2479_v1 }
 0x358   :  { %2258 = vmatpush3.bf16.msra.mxu0 %v2257_v20  ;;  %v1032_v20 = vld [vmem:[%s2950_s7 + $0x28] sm:$0xff] }
 0x359   :  { %2259 = vmatprep.subr.bf16.mxu0 %v2477_v0 }
 0x426   :  { %v581_v21 = vpop.f32.mrb[4].mxu0 }
 0x427   :  { %v2138_v22 = vpop.f32.mrb[5].mxu0 }
 0x428   :  { %v656_v23 = vpop.f32.mrb[4].mxu1  ;;  %v98_v22 = vld [vmem:[#allocation5] sm:$0xff] }
 0x429   :  { %v662_v24 = vrot.slane %v656_v23, 7  ;;  %v2143_v25 = vpop.f32.mrb[5].mxu1  ;;  %v99_v23 = vld [vmem:[#allocation5 + $0x8] sm:$0xff]  ;;  %v1011_v39 = vsel %vm104_vm1, %v98_v22, 0.0 }
 0x42b   :  { %v663_v26 = vsel %vm128_vm2, %v662_v24, %v581_v21  ;;  %v2260_v21 = vpack.c.bf16 %v1032_v20, %v1031_v19  ;;  %v1018_v24 = vsel %vm104_vm1, %v99_v23, 0.0 }
 0x42c   :  { %2153 = vmatmul.mubr.msk.f32.vlgmr.msra.gmra.mrb[6].mxu0 %vm104_vm1, %v663_v26  ;;  %v1012_v26 = vrot.slane %v1011_v39, 4 }
 0x42d   :  { %2173 = vmatprep.mubr.msk.f32.mxu0 %vm2478_vm0, %v2479_v1  ;;  %2261 = vmatpush3.bf16.msra.mxu0 %v2260_v21 }
 0x42e   :  { %2262 = vmatprep.subr.bf16.mxu0 %v2477_v0 }
 0x4ff   :  { %v732_v27 = vpop.f32.mrb[6].mxu0 }
 0x500   :  { %v743_v28 = vrot.slane %v732_v27, %v2687_v40  ;;  %v2154_v29 = vpop.f32.mrb[7].mxu0  ;;  %v1019_v27 = vrot.slane %v1018_v24, 4 }
 0x502   :  { %v744_v30 = vcombine.high %v743_v28, %v743_v28  ;;  %v751_v31 = vrot.slane %v743_v28, %v2687_v40 }
 0x504   :  { %2158 = vmatmul.mubr.msk.f32.vlgmr.msra.gmra.mrb[6].mxu1 %vm104_vm1, %v751_v31  ;;  %v758_v33 = vrot.slane %v744_v30, %v2687_v40  ;;  %v1033_v30 = vld [vmem:[%s2950_s7 + $0x30] sm:$0xff]  ;;  %v1034_v31 = vld [vmem:[%s2950_s7 + $0x38] sm:$0xff] }
 0x505   :  { %2161 = vmatpush3.xpose.msk.msra.mxu1 %vm104_vm1, %v836_v32  ;;  %2162 = vmatprep.mubr.msk.f32.mxu1 %vm2478_vm0, %v2479_v1  ;;  %v2263_v32 = vpack.c.bf16 %v1034_v31, %v1033_v30 }
 0x507   :  { %2264 = vmatpush3.bf16.msra.mxu0 %v2263_v32 }
 0x508   :  { %2163 = vmatmul.mubr.msk.f32.vlgmr.msra.gmra.mrb[8].mxu1 %vm104_vm1, %v758_v33  ;;  %v1013_v33 = vadd.f32 %v1012_v26, %v1011_v39  ;;  %2265 = vmatprep.subr.bf16.mxu0 %v2477_v0  ;;  %v101_v26 = vld [vmem:[#allocation7] sm:$0xff] }
 0x509   :  { %2195 = vmatprep.mubr.msk.f32.mxu1 %vm104_vm1, %v98_v22 }
 0x5d7   :  { %v831_v34 = vpop.f32.mrb[6].mxu1 }
 0x5d8   :  { %v2159_v36 = vpop.f32.mrb[7].mxu1  ;;  %v911_v37 = vmul.f32 0.17677669, %v831_v34  ;;  %v1020_v34 = vadd.f32 %v1019_v27, %v1018_v24 }
 0x5d9   :  { %v1185_v36 = vld [vmem:[#allocation8] sm:$0xff] }
 0x5da   :  { %2305 = vtanh.f32 %v911_v37  ;;  %v1186_v37 = vld [vmem:[#allocation8 + $0x8] sm:$0xff] }
 0x5db   :  { %v907_v38 = vpop.f32.mrb[8].mxu1 }
 0x5dc   :  { %v912_v41 = vmul.f32 0.17677669, %v907_v38  ;;  %v2164_v42 = vpop.f32.mrb[9].mxu1  ;;  %v2271_v38 = vpack.c.bf16 %v1186_v37, %v1185_v36 }
 0x5dd   :  { %v1021_v42 = vrot.slane %v1020_v34, 2 }
 0x5de   :  { %2307 = vtanh.f32 %v912_v41  ;;  %v1014_v41 = vrot.slane %v1013_v33, 2  ;;  %2272 = vmatprep.subr.bf16.mxu1 %v2271_v38 }
 0x5df   :  { %2274 = vmatpush3.bf16.msra.mxu1 %v2271_v38 }
 0x5e4   :  { %v2306_v43 = vpop.eup %2305 }
 0x5e5   :  { %v915_v46 = vmul.f32 10.0, %v2306_v43  ;;  %v1015_v43 = vadd.f32 %v1014_v41, %v1013_v33 }
 0x5e8   :  { %v2308_v44 = vpop.eup %2307 }
 0x5e9   :  { %v916_v45 = vmul.f32 10.0, %v2308_v44  ;;  %v1022_v44 = vadd.f32 %v1021_v42, %v1020_v34 }
 0x5eb   :  { %v919_v47 = vrot.slane %v916_v45, 7  ;;  %v1187_v45 = vld [vmem:[#allocation8 + $0x10] sm:$0xff] }
 0x5ed   :  { %v920_v48 = vsel %vm128_vm2, %v919_v47, %v915_v46  ;;  %v1188_v46 = vld [vmem:[#allocation8 + $0x18] sm:$0xff] }
 0x5ee   :  { %v922_v49 = vsel %vm103_vm3, %v920_v48, -1e+09  ;;  %v2275_v47 = vpack.c.bf16 %v1188_v46, %v1187_v45  ;;  %v1016_v48 = vrot.slane %v1015_v43, 1 }
 0x5ef   :  { %v923_v50 = vsel %vm472_vm4, %v922_v49, -inf }
 0x5f0   :  { %924 = vmax.xlane.f32.xlu1 %v923_v50  ;;  %2276 = vmatprep.subr.bf16.mxu1 %v2275_v47  ;;  %v1017_v50 = vadd.f32 %v1016_v48, %v1015_v43 }
 0x5f1   :  { %2278 = vmatpush3.bf16.msra.mxu1 %v2275_v47 }
 0x5f2   :  { %2198 = vmatprep.subr.mxu1 %v2479_v1 }
 0x5f4   :  { %2196 = vmatmul.mubr.msk.f32.vlgmr.msra.gmra.mrb[10].mxu1 %vm104_vm1, %v99_v23 }
 0x5f5   :  { %2200 = vmatprep.mubr.msk.f32.mxu1 %vm2478_vm0, %v2479_v1 }
 0x67d   :  { %v925_v51 = vpop.xlane.xlu1 %924 }
 0x67e   :  { %v926_v53 = vsub.f32 %v922_v49, %v925_v51  ;;  %v1023_v49 = vrot.slane %v1022_v44, 1 }
 0x680   :  { %v927_v54 = vmul.f32 1.442695, %v926_v53  ;;  %v1024_v51 = vadd.f32 %v1023_v49, %v1022_v44  ;;  %v1025_v53 = vmul.f32 0.125, %v1017_v50 }
 0x682   :  { %2309 = vpow2.f32 %v927_v54  ;;  %v1026_v54 = vmul.f32 0.125, %v1024_v51 }
 0x68c   :  { %v2310_v55 = vpop.eup %2309 }
 0x68d   :  { %v929_v56 = vsel %vm103_vm3, %v2310_v55, 0.0  ;;  %v1112_v55 = vsel %vm128_vm2, %v1026_v54, %v1025_v53 }
 0x68e   :  { %v930_v57 = vsel %vm472_vm4, %v929_v56, 0.0 }
 0x68f   :  { %931 = vadd.xlane.f32.xlu0 %v930_v57 }
 0x71c   :  { %v932_v58 = vpop.xlane.xlu0 %931 }
 0x71d   :  { %v933_v59 = vmax.f32 %v932_v58, 1e-09 }
 0x71f   :  { %2311 = vrcp.f32 %v933_v59 }
 0x729   :  { %v2312_v60 = vpop.eup %2311 }
 0x72a   :  { %v935_v61 = vmul.f32 %v2312_v60, %v929_v56 }
 0x72c   :  { %v940_v62 = vsel %vm472_vm4, %v935_v61, -inf  ;;  %v936_v63 = vsel %vm512_vm5, %v935_v61, 0.0 }
 0x72d   :  { %941 = vmax.xlane.f32.xlu1 %v940_v62  ;;  %937 = vst [vmem:[#allocation10] sm:$0x3] %v936_v63 }
 0x7ba   :  { %v942_v3 = vpop.xlane.xlu1 %941 }
 0x7bb   :  { %vm943_vm6 = vcmp.ge.f32.partialorder %v935_v61, %v942_v3 }
 0x7bc   :  { %v944_v52 = vsel %vm943_vm6, %v2762_v2, 8 }
 0x7bd   :  { %v945_v4 = vsel %vm472_vm4, %v944_v52, 2147483647 }
 0x7be   :  { %v947_v5 = vshra.s32 %v945_v4, 16  ;;  %v946_v7 = vand.u32 65535, %v945_v4 }
 0x7c0   :  { %v949_v6 = vcvt.s32.f32 %v947_v5  ;;  %v948_v9 = vcvt.s32.f32 %v946_v7 }
 0x7c2   :  { %950 = vmin.xlane.f32.xlu1 %v949_v6 }
 0x84f   :  { %v951_v8 = vpop.xlane.xlu1 %950 }
 0x850   :  { %vm952_vm7 = vcmp.eq.f32.partialorder %v949_v6, %v951_v8  ;;  %v957_v13 = vcvt.f32.s32 %v951_v8  ;;  %v1027_v8 = vld [vmem:[%s2950_s7] sm:$0xff] }
 0x851   :  { %v953_v10 = vsel %vm952_vm7, %v948_v9, inf }
 0x852   :  { %954 = vmin.xlane.f32.xlu1 %v953_v10  ;;  %v958_v15 = vshll.u32 %v957_v13, 16 }
 0x8df   :  { %v955_v14 = vpop.xlane.xlu1 %954 }
 0x8e0   :  { %v956_v35 = vcvt.f32.s32 %v955_v14 }
 0x8e2   :  { %v959_v16 = vadd.s32 %v958_v15, %v956_v35  ;;  %v1029_v15 = vld [vmem:[%s2950_s7 + $0x10] sm:$0xff]  ;;  %v1030_v35 = vld [vmem:[%s2950_s7 + $0x18] sm:$0xff] }
 0x8e4   :  { %1970 = vst.msk [vmem:[%s2955_s12] sm:$0x3] %vm1969_vm8, %v959_v16  ;;  %vm960_vm9 = vcmp.eq.s32.totalorder %v2762_v2, %v959_v16 }
 0x8e5   :  { %v2025_v25 = vsel %vm960_vm9, 1.0, %v2479_v1 }
 0x8e6   :  { %v973_v28 = vrot.slane %v2025_v25, %v972_v17  ;;  %v966_v29 = vrot.slane %v2025_v25, %v965_v18  ;;  %v2269_v17 = vpack.c.bf16 %v1030_v35, %v1029_v15  ;;  %v2197_v18 = vpop.f32.mrb[10].mxu1  ;;  %v102_v25 = vld [vmem:[#allocation7 + $0x8] sm:$0xff] }
 0x8e7   :  { %v2821_v19 = vpop.f32.mrb[11].mxu1 }
 0x8e8   :  { %975 = vbcast.lane.b32.xlu0 %v973_v28, 256  ;;  %968 = vbcast.lane.b32.xlu1 %v966_v29, 256 }
 0x8e9   :  { %2199 = vmatpush3.xpose.msk.msra.mxu1 %vm104_vm1, %v2821_v19 }
 0x8ea   :  { %2203 = vmatprep.subr.mxu1 %v2479_v1 }
 0x95a   :  { %v976_v56 = vpop.permute.xlu0 %975  ;;  %v969_v57 = vpop.permute.xlu1 %968 }
 0x95b   :  { %v994_v58 = vmul.f32 %v976_v56, %v2652_v12  ;;  %v993_v59 = vmul.f32 %v969_v57, %v2650_v11  ;;  %v1028_v11 = vld [vmem:[%s2950_s7 + $0x8] sm:$0xff]  ;;  %v978_v27 = vmul.f32 %v976_v56, %v102_v25  ;;  %v977_v28 = vmul.f32 %v969_v57, %v101_v26 }
 0x95c   :  { %v2266_v14 = vpack.c.bf16 %v1028_v11, %v1027_v8 }
 0x95d   :  { %v1002_v60 = vsel %vm104_vm1, %v994_v58, 0.0  ;;  %v995_v61 = vsel %vm104_vm1, %v993_v59, 0.0  ;;  %v986_v29 = vsel %vm512_vm5, %v978_v27, 0.0  ;;  %v979_v30 = vsel %vm512_vm5, %v977_v28, 0.0 }
 0x95e   :  { %v1003_v62 = vrot.slane %v1002_v60, 4  ;;  %v996_v63 = vrot.slane %v995_v61, 4  ;;  %v987_v31 = vrot.slane %v986_v29, 4  ;;  %v980_v32 = vrot.slane %v979_v30, 4 }
 0x960   :  { %v1004_v3 = vadd.f32 %v1003_v62, %v1002_v60  ;;  %v997_v52 = vadd.f32 %v996_v63, %v995_v61  ;;  %v988_v33 = vadd.f32 %v987_v31, %v986_v29  ;;  %v981_v34 = vadd.f32 %v980_v32, %v979_v30 }
 0x962   :  { %v1005_v4 = vrot.slane %v1004_v3, 2  ;;  %v998_v5 = vrot.slane %v997_v52, 2  ;;  %v989_v36 = vrot.slane %v988_v33, 2  ;;  %v982_v37 = vrot.slane %v981_v34, 2 }
 0x964   :  { %v1006_v6 = vadd.f32 %v1005_v4, %v1004_v3  ;;  %v999_v7 = vadd.f32 %v998_v5, %v997_v52  ;;  %v990_v38 = vadd.f32 %v989_v36, %v988_v33  ;;  %v983_v41 = vadd.f32 %v982_v37, %v981_v34 }
 0x966   :  { %v1007_v12 = vrot.slane %v1006_v6, 1  ;;  %v1000_v9 = vrot.slane %v999_v7, 1  ;;  %v991_v42 = vrot.slane %v990_v38, 1  ;;  %v984_v43 = vrot.slane %v983_v41, 1 }
 0x968   :  { %v1008_v10 = vadd.f32 %v1007_v12, %v1006_v6  ;;  %v1001_v13 = vadd.f32 %v1000_v9, %v999_v7  ;;  %v2839_v46 = vadd.f32 %v991_v42, %v990_v38  ;;  %v2841_v47 = vadd.f32 %v984_v43, %v983_v41 }
 0x96a   :  { %v1037_v16 = vsel %vm128_vm2, %v1008_v10, %v1001_v13  ;;  %vm1010_vm10 = vcmp.gt.f32.partialorder %v2839_v46, 0.0  ;;  %vm1009_vm11 = vcmp.gt.f32.partialorder %v2841_v47, 0.0  ;;  %v1189_v13 = vld [vmem:[%s2952_s9] sm:$0xff] }
 0x96b   :  { %2174 = vmatmul.mubr.msk.f32.vlgmr.msra.gmra.mrb[8].mxu0 %vm104_vm1, %v1037_v16 }
 0x96c   :  { %2267 = vmatpush3.bf16.msra.mxu0 %v2266_v14  ;;  %2184 = vmatprep.mubr.msk.f32.mxu0 %vm2478_vm0, %v2479_v1  ;;  %v1190_v14 = vld [vmem:[%s2952_s9 + $0x8] sm:$0xff] }
 0x96d   :  { %2268 = vmatprep.subr.bf16.mxu0 %v2477_v0  ;;  %v2280_v35 = vpack.c.bf16 %v1190_v14, %v1189_v13 }
 0x970   :  { %2270 = vmatpush3.bf16.msra.mxu0 %v2269_v17 }
 0x971   :  { %2208 = vmatprep.subr.mxu0 %v2479_v1 }
 0x973   :  { %2185 = vmatmul.mubr.msk.f32.vlgmr.msra.gmra.mrb[8].mxu0 %vm104_vm1, %v1112_v55 }
 0x974   :  { %2210 = vmatprep.mubr.msk.f32.mxu0 %vm2478_vm0, %v2479_v1 }
 0xa46   :  { %v1181_v20 = vpop.f32.mrb[8].mxu0 }
 0xa47   :  { %v1281_v21 = vrot.slane %v1181_v20, %v2687_v40  ;;  %v2186_v22 = vpop.f32.mrb[9].mxu0  ;;  %v1191_v20 = vld [vmem:[%s2952_s9 + $0x10] sm:$0xff] }
 0xa49   :  { %v1282_v23 = vcombine.high %v1281_v21, %v1281_v21  ;;  %v1289_v39 = vrot.slane %v1281_v21, %v2687_v40  ;;  %v1192_v21 = vld [vmem:[%s2952_s9 + $0x18] sm:$0xff]  ;;  %s2483_s9 = smov [#allocation10]  }
 0xa4a   :  { %v2283_v22 = vpack.c.bf16 %v1192_v21, %v1191_v20  ;;  %s1978_s8 = sshll.u32 %s2483_s9, 4  ;;  %s1979_s8 = int_to_ptr.vmem [resolvable:$true] %s1978_s8 }
 0xa4b   :  { %2201 = vmatmul.mubr.msk.f32.vlgmr.msra.gmra.mrb[12].mxu1 %vm104_vm1, %v1289_v39  ;;  %v1296_v24 = vrot.slane %v1282_v23, %v2687_v40  ;;  %s2417_s21 = scalar_lea.vmem %s1979_s8, 32  ;;  %p2422_p5 = scmp.lt.s32.totalorder %s1979_s8, %s1979_s8 }
 0xa4c   :  { %2204 = vmatpush3.xpose.msk.msra.mxu1 %vm104_vm1, %v2197_v18  ;;  %2205 = vmatprep.mubr.msk.f32.mxu1 %vm2478_vm0, %v2479_v1  ;;  %p2418_p4 = scmp.ne.s32.totalorder %s1979_s8, %s2417_s21  ;;  %p2423_p6 = scmp.lt.s32.totalorder %s2417_s21, %s2417_s21 }
 0xa4d   :  { %2213 = vmatprep.subr.mxu1 %v2479_v1 }
 0xa4e   :  { %p2424_p7 = por %p2423_p6, %p2422_p5 }
 0xa4f   :  { %2206 = vmatmul.mubr.msk.f32.vlgmr.msra.gmra.mrb[14].mxu1 %vm104_vm1, %v1296_v24 }
 0xa50   :  { %2215 = vmatprep.mubr.msk.f32.mxu1 %vm2478_vm0, %v2479_v1  ;;  %p2425_p8 = pnand %p2424_p7, %p2418_p4 }
 0xb1e   :  { %v1368_v44 = vpop.f32.mrb[12].mxu1 }
 0xb1f   :  { %v2202_v45 = vpop.f32.mrb[13].mxu1  ;;  %v1447_v49 = vmul.f32 0.17677669, %v1368_v44 }
 0xb21   :  { %v1449_v55 = vsel %vm1009_vm11, %v1447_v49, -1e+09 }
 0xb22   :  { %v1443_v48 = vpop.f32.mrb[14].mxu1 }
 0xb23   :  { %v1448_v50 = vmul.f32 0.17677669, %v1443_v48  ;;  %v2207_v51 = vpop.f32.mrb[15].mxu1 }
 0xb25   :  { %v1450_v53 = vsel %vm1010_vm10, %v1448_v50, -1e+09 }
 0xb26   :  { %v1453_v54 = vrot.slane %v1450_v53, 7 }
 0xb28   :  { %v1454_v56 = vsel %vm128_vm2, %v1453_v54, %v1449_v55 }
 0xb29   :  { %v1456_v57 = vsel %vm472_vm4, %v1454_v56, -inf }
 0xb2a   :  { %1457 = vmax.xlane.f32.xlu1 %v1456_v57 }
 0xb3b   :  { %1563 = vrot.lane.b32.xlu1 %v2197_v18, %s2481_s4 }
 0xb3f   :  { %1738 = vrot.lane.b32.xlu1 %v2821_v19, %s2482_s19 }
 0xb43   :  { %1814 = vrot.lane.b32.xlu1 %v2197_v18, %s2482_s19 }
 0xbb7   :  { %v1458_v58 = vpop.xlane.xlu1 %1457 }
 0xbb8   :  { %v1460_v59 = vrot.slane %v1458_v58, 1  ;;  %v1463_v60 = vsub.f32 %v1449_v55, %v1458_v58 }
 0xbba   :  { %v1464_v61 = vsub.f32 %v1450_v53, %v1460_v59  ;;  %v1465_v62 = vmul.f32 1.442695, %v1463_v60 }
 0xbbb   :  { %v1564_v63 = vpop.permute.xlu1 %1563 }
 0xbbc   :  { %v1467_v3 = vmul.f32 1.442695, %v1464_v61  ;;  %2214 = vmatpush3.msra.mxu1 %v1564_v63  ;;  %2313 = vpow2.f32 %v1465_v62 }
 0xbbd   :  { %2229 = vmatprep.subr.mxu1 %v2479_v1 }
 0xbbe   :  { %2315 = vpow2.f32 %v1467_v3 }
 0xbc6   :  { %v2314_v52 = vpop.eup %2313 }
 0xbc7   :  { %v1469_v7 = vsel %vm1009_vm11, %v2314_v52, 0.0 }
 0xbc8   :  { %v2316_v4 = vpop.eup %2315 }
 0xbc9   :  { %v1470_v5 = vsel %vm1010_vm10, %v2316_v4, 0.0 }
 0xbca   :  { %v1473_v6 = vrot.slane %v1470_v5, 7 }
 0xbcc   :  { %v1474_v8 = vsel %vm128_vm2, %v1473_v6, %v1469_v7 }
 0xbcd   :  { %v1476_v11 = vsel %vm472_vm4, %v1474_v8, 0.0 }
 0xbce   :  { %1477 = vadd.xlane.f32.xlu0 %v1476_v11 }
 0xbe4   :  { %1487 = vrot.lane.b32.xlu0 %v2821_v19, %s2481_s4  ;;  %v1739_v19 = vpop.permute.xlu1 %1738 }
 0xbe8   :  { %v1815_v32 = vpop.permute.xlu1 %1814 }
 0xc5b   :  { %v1478_v12 = vpop.xlane.xlu0 %1477 }
 0xc5c   :  { %v1479_v9 = vmax.f32 %v1478_v12, 1e-09 }
 0xc5e   :  { %2317 = vrcp.f32 %v1479_v9 }
 0xc5f   :  { %v1488_v10 = vpop.permute.xlu0 %1487 }
 0xc60   :  { %2209 = vmatpush3.msra.mxu0 %v1488_v10 }
 0xc61   :  { %2279 = vmatprep.subr.bf16.mxu0 %v2477_v0 }
 0xc68   :  { %v2318_v15 = vpop.eup %2317 }
 0xc69   :  { %v1482_v16 = vrot.slane %v2318_v15, 1  ;;  %v1485_v17 = vmul.f32 %v2318_v15, %v1469_v7 }
 0xc6b   :  { %2211 = vmatmul.mubr.msk.f32.vlgmr.msra.gmra.mrb[10].mxu0 %vm512_vm5, %v1485_v17  ;;  %v1486_v18 = vmul.f32 %v1482_v16, %v1470_v5 }
 0xc6c   :  { %2281 = vmatpush3.bf16.msra.mxu0 %v2280_v35  ;;  %2226 = vmatprep.mubr.msk.f32.mxu0 %vm2478_vm0, %v2479_v1 }
 0xc6d   :  { %2216 = vmatmul.mubr.msk.f32.vlgmr.msra.gmra.mrb[16].mxu1 %vm512_vm5, %v1486_v18  ;;  %2282 = vmatprep.subr.bf16.mxu0 %v2477_v0 }
 0xc6e   :  { %2230 = vmatpush3.xpose.msk.msra.mxu1 %vm104_vm1, %v1739_v19  ;;  %2231 = vmatprep.mubr.msk.f32.mxu1 %vm2478_vm0, %v2479_v1 }
 0xc6f   :  { %2234 = vmatprep.subr.mxu1 %v2479_v1 }
 0xc70   :  { %2284 = vmatpush3.bf16.msra.mxu0 %v2283_v22 }
 0xd3e   :  { %v1559_v23 = vpop.f32.mrb[10].mxu0 }
 0xd3f   :  { %v2212_v39 = vpop.f32.mrb[11].mxu0 }
 0xd40   :  { %v1635_v0 = vpop.f32.mrb[16].mxu1 }
 0xd41   :  { %v1641_v24 = vrot.slane %v1635_v0, 7  ;;  %v2217_v25 = vpop.f32.mrb[17].mxu1 }
 0xd43   :  { %v1642_v26 = vsel %vm128_vm2, %v1641_v24, %v1559_v23 }
 0xd44   :  { %2227 = vmatmul.mubr.msk.f32.vlgmr.msra.gmra.mrb[12].mxu0 %vm104_vm1, %v1642_v26 }
 0xe17   :  { %v1711_v27 = vpop.f32.mrb[12].mxu0 }
 0xe18   :  { %v1722_v28 = vrot.slane %v1711_v27, %v2687_v40  ;;  %v2228_v29 = vpop.f32.mrb[13].mxu0 }
 0xe1a   :  { %v1723_v30 = vcombine.high %v1722_v28, %v1722_v28  ;;  %v1730_v31 = vrot.slane %v1722_v28, %v2687_v40 }
 0xe1c   :  { %2232 = vmatmul.mubr.msk.f32.vlgmr.msra.gmra.mrb[18].mxu1 %vm104_vm1, %v1730_v31  ;;  %v1737_v33 = vrot.slane %v1723_v30, %v2687_v40 }
 0xe1d   :  { %2235 = vmatpush3.xpose.msk.msra.mxu1 %vm104_vm1, %v1815_v32  ;;  %2236 = vmatprep.mubr.msk.f32.mxu1 %vm2478_vm0, %v2479_v1 }
 0xe20   :  { %2237 = vmatmul.mubr.msk.f32.vlgmr.msra.gmra.mrb[20].mxu1 %vm104_vm1, %v1737_v33 }
 0xeef   :  { %v1810_v34 = vpop.f32.mrb[18].mxu1 }
 0xef0   :  { %v1890_v36 = vmul.f32 0.17677669, %v1810_v34  ;;  %v2233_v37 = vpop.f32.mrb[19].mxu1 }
 0xef2   :  { %2319 = vtanh.f32 %v1890_v36 }
 0xef3   :  { %v1886_v38 = vpop.f32.mrb[20].mxu1 }
 0xef4   :  { %v1891_v41 = vmul.f32 0.17677669, %v1886_v38  ;;  %v2238_v42 = vpop.f32.mrb[21].mxu1 }
 0xef6   :  { %2321 = vtanh.f32 %v1891_v41 }
 0xefc   :  { %v2320_v43 = vpop.eup %2319 }
 0xefd   :  { %v1894_v45 = vmul.f32 10.0, %v2320_v43 }
 0xeff   :  { %v1896_v40 = vsel %vm1009_vm11, %v1894_v45, -1e+09 }
 0xf00   :  { %v2322_v44 = vpop.eup %2321 }
 0xf01   :  { %v1895_v48 = vmul.f32 10.0, %v2322_v44 }
 0xf03   :  { %v1897_v49 = vsel %vm1010_vm10, %v1895_v48, -1e+09 }
 0xf04   :  { %v1900_v1 = vrot.slane %v1897_v49, 7 }
 0xf06   :  { %v1901_v50 = vsel %vm128_vm2, %v1900_v1, %v1896_v40 }
 0xf07   :  { %v1903_v51 = vsel %vm472_vm4, %v1901_v50, -inf }
 0xf08   :  { %1904 = vmax.xlane.f32.xlu0 %v1903_v51 }
 0xf95   :  { %v1905_v53 = vpop.xlane.xlu0 %1904 }
 0xf96   :  { %v1907_v54 = vrot.slane %v1905_v53, 1  ;;  %v1910_v55 = vsub.f32 %v1896_v40, %v1905_v53 }
 0xf98   :  { %v1911_v56 = vsub.f32 %v1897_v49, %v1907_v54  ;;  %v1912_v57 = vmul.f32 1.442695, %v1910_v55 }
 0xf9a   :  { %v1914_v58 = vmul.f32 1.442695, %v1911_v56  ;;  %2323 = vpow2.f32 %v1912_v57 }
 0xf9c   :  { %2325 = vpow2.f32 %v1914_v58 }
 0xfa4   :  { %v2324_v59 = vpop.eup %2323 }
 0xfa5   :  { %v1916_v63 = vsel %vm1009_vm11, %v2324_v59, 0.0 }
 0xfa6   :  { %v2326_v60 = vpop.eup %2325 }
 0xfa7   :  { %v1917_v61 = vsel %vm1010_vm10, %v2326_v60, 0.0 }
 0xfa8   :  { %v1920_v62 = vrot.slane %v1917_v61, 7 }
 0xfaa   :  { %v1921_v3 = vsel %vm128_vm2, %v1920_v62, %v1916_v63 }
 0xfab   :  { %v1923_v52 = vsel %vm472_vm4, %v1921_v3, 0.0 }
 0xfac   :  { %1924 = vadd.xlane.f32.xlu1 %v1923_v52 }
0x1039   :  { %v1925_v4 = vpop.xlane.xlu1 %1924 }
0x103a   :  { %v1926_v5 = vmax.f32 %v1925_v4, 1e-09 }
0x103c   :  { %2327 = vrcp.f32 %v1926_v5 }
0x1046   :  { %v2328_v6 = vpop.eup %2327 }
0x1047   :  { %v1929_v7 = vrot.slane %v2328_v6, 1  ;;  %v1932_v11 = vmul.f32 %v2328_v6, %v1916_v63 }
0x1049   :  { %v1933_v8 = vmul.f32 %v1929_v7, %v1917_v61 }
0x104b   :  { %v1936_v12 = vrot.slane %v1933_v8, 7 }
0x104d   :  { %v1937_v46 = vsel %vm128_vm2, %v1936_v12, %v1932_v11 }
0x104e   :  { %v1941_v9 = vsel %vm472_vm4, %v1937_v46, -inf  ;;  %v1939_v47 = vsel %vm512_vm5, %v1937_v46, 0.0 }
0x104f   :  { %1942 = vmax.xlane.f32.xlu0 %v1941_v9  ;;  %1940 = vst [vmem:[#allocation11] sm:$0x3] %v1939_v47 }
0x10dc   :  { %v1943_v10 = vpop.xlane.xlu0 %1942 }
0x10dd   :  { %v1945_v13 = vrot.slane %v1943_v10, 1  ;;  %vm1948_vm12 = vcmp.ge.f32.partialorder %v1932_v11, %v1943_v10 }
0x10de   :  { %v1950_v35 = vsel %vm1948_vm12, %v2762_v2, 8 }
0x10df   :  { %vm1949_vm13 = vcmp.ge.f32.partialorder %v1933_v8, %v1945_v13 }
0x10e0   :  { %v1951_v14 = vsel %vm1949_vm13, %v2762_v2, 8 }
0x10e1   :  { %v1952_v15 = vrot.slane %v1951_v14, 7 }
0x10e3   :  { %v1953_v16 = vsel %vm128_vm2, %v1952_v15, %v1950_v35 }
0x10e4   :  { %v1954_v17 = vsel %vm472_vm4, %v1953_v16, 2147483647 }
0x10e5   :  { %v1956_v18 = vshra.s32 %v1954_v17, 16  ;;  %v1955_v20 = vand.u32 65535, %v1954_v17 }
0x10e7   :  { %v1958_v19 = vcvt.s32.f32 %v1956_v18  ;;  %v1957_v22 = vcvt.s32.f32 %v1955_v20 }
0x10e9   :  { %1959 = vmin.xlane.f32.xlu0 %v1958_v19 }
0x1176   :  { %v1960_v21 = vpop.xlane.xlu0 %1959 }
0x1177   :  { %vm1961_vm14 = vcmp.eq.f32.partialorder %v1958_v19, %v1960_v21 }
0x1178   :  { %v1962_v23 = vsel %vm1961_vm14, %v1957_v22, inf }
0x1179   :  { %1963 = vmin.xlane.f32.xlu1 %v1962_v23 }
0x117a   :  { %2428 = shalt.err (!%p2425_p8)
}
0x117b   :  { %s2429_s0 = scalar_lea.hbm %s2953_s10, 32 }
0x117c   :  { %p2430_p9 = scmp.ne.s32.totalorder %s2953_s10, %s2429_s0  ;;  %p2433_p10 = scmp.lt.u32.totalorder %s2429_s0, %s2953_s10 }
0x117e   :  { %p2435_p11 = pnand %p2433_p10, %p2430_p9 }
0x1180   :  { %2438 = shalt.err (!%p2435_p11)
}
0x1181   :  { %1981 = dma.vmem_to_hbm [thread:$0]  %s1979_s8, 32, %s2953_s10, [#allocation4]  }
0x1182   :  { %s2439_s5 = scalar_lea.vmem %s1989_s20, 32  ;;  %p2444_p13 = scmp.lt.s32.totalorder %s1989_s20, %s1989_s20 }
0x1183   :  { %p2440_p12 = scmp.ne.s32.totalorder %s1989_s20, %s2439_s5  ;;  %p2445_p0 = scmp.lt.s32.totalorder %s2439_s5, %s2439_s5 }
0x1185   :  { %p2446_p1 = por %p2445_p0, %p2444_p13 }
0x1187   :  { %p2447_p2 = pnand %p2446_p1, %p2440_p12 }
0x1189   :  { %2450 = shalt.err (!%p2447_p2)
}
0x118a   :  { %s2451_s24 = scalar_lea.hbm %s2954_s11, 32 }
0x118b   :  { %p2452_p3 = scmp.ne.s32.totalorder %s2954_s11, %s2451_s24  ;;  %p2455_p4 = scmp.lt.u32.totalorder %s2451_s24, %s2954_s11 }
0x118d   :  { %p2457_p5 = pnand %p2455_p4, %p2452_p3 }
0x118f   :  { %2460 = shalt.err (!%p2457_p5)
}
0x1190   :  { %1991 = dma.vmem_to_hbm [thread:$0]  %s1989_s20, 32, %s2954_s11, [#allocation12]   ;;  %v1966_v2 = vcvt.f32.s32 %v1960_v21 }
0x1192   :  { %v1967_v0 = vshll.u32 %v1966_v2, 16 }
0x1206   :  { %v1964_v39 = vpop.xlane.xlu1 %1963 }
0x1207   :  { %v1965_v24 = vcvt.f32.s32 %v1964_v39 }
0x1209   :  { %v1968_v25 = vadd.s32 %v1967_v0, %v1965_v24 }
0x120b   :  { %1971 = vst.msk [vmem:[%s2956_s13] sm:$0x3] %vm1969_vm8, %v1968_v25 }
0x120c   :  { %2467 = dma.done.wait [#allocation4], 32  }
0x120d   :  { %2468 = vsyncadd [#allocation4], 4294967264 }
0x120e   :  { %2469 = dma.done.wait [#allocation12], 32  }
0x120f   :  { %2470 = vsyncadd [#allocation12], 4294967264 }
0x1210   :  { %2006 = vsyncpa [#allocation3], 1 }
0x1211   :  { %2007 = vsyncpa [#allocation6], 1 }
0x1212   :  { %2008 = vsyncpa [#allocation9], 1 }
0x1213   :  { %2009 = vsyncpa [#allocation4], 1 }
0x1214   :  { %2010 = vsyncpa [#allocation12], 1 }

</bundles_post_ra>
